<compile_context>
chip_gen: v7x
topology: tpu7x:2x2x1
jax: 0.10.0
libtpu: 0.0.40
codegen_flags: <defaults>
</compile_context>

<pallas_src>
import functools

import jax
import jax.numpy as jnp
from jax.experimental import pallas as pl
from jax.experimental.pallas import tpu as pltpu

_SUBLANES = 8
_LANES = 128


def _round_up(x, m):
    return -(-x // m) * m


# ----------------------------------------------------------------------------
# Fused kernel: stacked LSTM recurrence + relu(linear1) + relu(linear2)
# Gate order follows PyTorch: [i, f, g, o].
# ----------------------------------------------------------------------------
def _fused_kernel(*args, T, Bp, n_layers):
    """args layout:
      inputs : x2d, wih0_t, whh0_t, b0, (wcat_l, b_l) for layers 1..L-1,
               wl1_t, bl1, wl2_t (lane-padded), bl2 (lane-padded)
      outputs: o_ref  (T*Bp, out_padded)
      scratch: hlast_sc (T*Bp, H) -- last-layer hidden state for every timestep
    """
    n_in = 4 + 2 * (n_layers - 1) + 4
    x_ref, wih0_ref, whh0_ref, b0_ref = args[:4]
    rest = args[4:4 + 2 * (n_layers - 1)]
    wl1_ref, bl1_ref, wl2_ref, bl2_ref = args[n_in - 4:n_in]
    o_ref = args[n_in]
    hlast_sc = args[n_in + 1]

    H = whh0_ref.shape[0]
    H4 = 4 * H
    N = T * Bp

    def lstm_cell(gates, c_prev):
        # PyTorch gate order [i, f, g, o]; keep activations in f32.
        i = jax.nn.sigmoid(gates[:, 0 * H:1 * H])
        f = jax.nn.sigmoid(gates[:, 1 * H:2 * H])
        g = jnp.tanh(gates[:, 2 * H:3 * H])
        o = jax.nn.sigmoid(gates[:, 3 * H:4 * H])
        c = f * c_prev + i * g
        return o * jnp.tanh(c), c

    # Layer-0 input projection for ALL timesteps in one MXU pass, off the serial
    # recurrence path. The fused (b_ih0 + b_hh0) bias is folded in once.
    xw0 = jnp.dot(x_ref[...], wih0_ref[...], preferred_element_type=jnp.float32)
    xw0 = xw0 + jnp.broadcast_to(b0_ref[...], (N, H4))

    # Hoist weight loads / bias broadcasts out of the unrolled time loop
    # (JAX does not CSE broadcast_in_dim inside the loop).
    whh0 = whh0_ref[...]
    wcats = [rest[2 * l][...] for l in range(n_layers - 1)]
    biases = [jnp.broadcast_to(rest[2 * l + 1][...], (Bp, H4))
              for l in range(n_layers - 1)]

    hs = [jnp.zeros((Bp, H), jnp.float32) for _ in range(n_layers)]
    cs = [jnp.zeros((Bp, H), jnp.float32) for _ in range(n_layers)]

    # T is small and static -> fully unrolled serial recurrence; h/c stay in vregs.
    for t in range(T):
        gates0 = xw0[t * Bp:(t + 1) * Bp, :] + jnp.dot(
            hs[0], whh0, preferred_element_type=jnp.float32)
        hs[0], cs[0] = lstm_cell(gates0, cs[0])
        for l in range(1, n_layers):
            # Single fused (input ++ recurrent) matmul per upper layer:
            #   [h_{l-1} ; h_l] @ [W_ih_l^T ; W_hh_l^T]
            inp = jnp.concatenate([hs[l - 1], hs[l]], axis=-1)          # (Bp, 2H)
            gates = jnp.dot(inp, wcats[l - 1],
                            preferred_element_type=jnp.float32) + biases[l - 1]
            hs[l], cs[l] = lstm_cell(gates, cs[l])
        # TODO(synk): inter-layer LSTM dropout (p=0.2) is identity in eval mode.
        hlast_sc[t * Bp:(t + 1) * Bp, :] = hs[-1]

    # Dense head over the whole (T*Bp, H) slab in two MXU passes.
    h_all = hlast_sc[...]
    d1 = jnp.dot(h_all, wl1_ref[...], preferred_element_type=jnp.float32)
    d1 = jnp.maximum(d1 + jnp.broadcast_to(bl1_ref[...], (N, d1.shape[1])), 0.0)
    # TODO(synk): nn.Dropout(p=0.2) after linear1 is identity in eval mode;
    # training-mode dropout is not implemented.
    d2 = jnp.dot(d1, wl2_ref[...], preferred_element_type=jnp.float32)
    d2 = jnp.maximum(d2 + jnp.broadcast_to(bl2_ref[...], (N, d2.shape[1])), 0.0)
    # Lane-dense unmasked store (out padded to 128 lanes).
    o_ref[...] = d2.astype(o_ref.dtype)


# ----------------------------------------------------------------------------
# One-time weight packing: transpose / concat / lane-pad / cast to f32.
# ----------------------------------------------------------------------------
def prepare_params(params):
    lstm = params["lstm"]
    l0 = lstm[0]
    packed = {
        "n_layers": len(lstm),
        "wih0": jnp.transpose(l0["w_ih"]).astype(jnp.float32),              # (Din, 4H)
        "whh0": jnp.transpose(l0["w_hh"]).astype(jnp.float32),              # (H, 4H)
        "b0": (l0["b_ih"] + l0["b_hh"]).reshape(1, -1).astype(jnp.float32),  # (1, 4H)
        "layers": [],
    }
    for layer in lstm[1:]:
        wcat = jnp.concatenate(
            [jnp.transpose(layer["w_ih"]), jnp.transpose(layer["w_hh"])],
            axis=0).astype(jnp.float32)                                      # (2H, 4H)
        b = (layer["b_ih"] + layer["b_hh"]).reshape(1, -1).astype(jnp.float32)
        packed["layers"].append((wcat, b))

    packed["wl1"] = jnp.transpose(params["w1"]).astype(jnp.float32)          # (H, dense)
    packed["bl1"] = params["b1"].reshape(1, -1).astype(jnp.float32)          # (1, dense)

    w2t = jnp.transpose(params["w2"]).astype(jnp.float32)                    # (dense, out)
    out_dim = w2t.shape[1]
    out_p = _round_up(out_dim, _LANES)                                       # lane-dense
    packed["wl2"] = jnp.pad(w2t, ((0, 0), (0, out_p - out_dim)))
    packed["bl2"] = jnp.pad(params["b2"].reshape(1, -1).astype(jnp.float32),
                            ((0, 0), (0, out_p - out_dim)))
    packed["out_dim"] = out_dim
    return packed


# ----------------------------------------------------------------------------
# Forward wrapper
# ----------------------------------------------------------------------------
def admissions_lstm_forward(packed, input_seq):
    """input_seq: (B, T, input_size), batch_first like PyTorch.
    Returns (B, T, output_size * output_seq_len)."""
    B, T, _ = input_seq.shape
    Bp = _round_up(B, _SUBLANES)          # pad batch to full sublane occupancy
    n_layers = packed["n_layers"]
    H = packed["whh0"].shape[0]
    out_p = packed["wl2"].shape[1]
    out_dim = packed["out_dim"]

    # time-major + batch pad, flattened to a (T*Bp, Din) slab for the kernel.
    x = jnp.transpose(input_seq, (1, 0, 2)).astype(jnp.float32)   # (T, B, Din)
    if Bp != B:
        x = jnp.pad(x, ((0, 0), (0, Bp - B), (0, 0)))
    x2d = x.reshape(T * Bp, -1)

    layer_args = []
    for wcat, b in packed["layers"]:
        layer_args += [wcat, b]

    inputs = (x2d, packed["wih0"], packed["whh0"], packed["b0"],
              *layer_args,
              packed["wl1"], packed["bl1"], packed["wl2"], packed["bl2"])

    kernel = functools.partial(_fused_kernel, T=T, Bp=Bp, n_layers=n_layers)

    out = pl.pallas_call(
        kernel,
        out_shape=jax.ShapeDtypeStruct((T * Bp, out_p), jnp.float32),
        grid_spec=pltpu.PrefetchScalarGridSpec(
            num_scalar_prefetch=0,
            grid=(1,),  # single invocation: everything is VMEM-resident (few KB)
            in_specs=[pl.BlockSpec(a.shape, lambda i: (0, 0)) for a in inputs],
            out_specs=pl.BlockSpec((T * Bp, out_p), lambda i: (0, 0)),
            scratch_shapes=[pltpu.VMEM((T * Bp, H), jnp.float32)],
        ),
        compiler_params=pltpu.CompilerParams(
            dimension_semantics=("arbitrary",)),
    )(*inputs)

    out = out.reshape(T, Bp, out_p)[:, :B, :out_dim]
    return jnp.transpose(out, (1, 0, 2))


# ----------------------------------------------------------------------------
# Parameter init (PyTorch-style uniform) and a pure-JAX reference for checking.
# ----------------------------------------------------------------------------
def init_params(key, input_size, hidden, dense, output_size, output_seq_len, lstm_layers):
    params = {"lstm": []}
    k_lstm = 1.0 / jnp.sqrt(hidden)
    for layer in range(lstm_layers):
        d_in = input_size if layer == 0 else hidden
        key, k1, k2, k3, k4 = jax.random.split(key, 5)
        params["lstm"].append({
            "w_ih": jax.random.uniform(k1, (4 * hidden, d_in), jnp.float32, -k_lstm, k_lstm),
            "w_hh": jax.random.uniform(k2, (4 * hidden, hidden), jnp.float32, -k_lstm, k_lstm),
            "b_ih": jax.random.uniform(k3, (4 * hidden,), jnp.float32, -k_lstm, k_lstm),
            "b_hh": jax.random.uniform(k4, (4 * hidden,), jnp.float32, -k_lstm, k_lstm),
        })
    out_dim = output_size * output_seq_len
    key, k1, k2, k3, k4 = jax.random.split(key, 5)
    k_l1 = 1.0 / jnp.sqrt(hidden)
    k_l2 = 1.0 / jnp.sqrt(dense)
    params["w1"] = jax.random.uniform(k1, (dense, hidden), jnp.float32, -k_l1, k_l1)
    params["b1"] = jax.random.uniform(k2, (dense,), jnp.float32, -k_l1, k_l1)
    params["w2"] = jax.random.uniform(k3, (out_dim, dense), jnp.float32, -k_l2, k_l2)
    params["b2"] = jax.random.uniform(k4, (out_dim,), jnp.float32, -k_l2, k_l2)
    return params


def reference_forward(params, input_seq):
    """Plain jax.numpy reference (eval mode) for correctness checking."""
    x = input_seq.astype(jnp.float32)
    B = x.shape[0]
    seq = x
    for layer in params["lstm"]:
        w_ih, w_hh = layer["w_ih"], layer["w_hh"]
        b = layer["b_ih"] + layer["b_hh"]
        H = w_hh.shape[1]

        def step(carry, x_t, w_ih=w_ih, w_hh=w_hh, b=b, H=H):
            h, c = carry
            gates = x_t @ w_ih.T + h @ w_hh.T + b
            i = jax.nn.sigmoid(gates[:, 0 * H:1 * H])
            f = jax.nn.sigmoid(gates[:, 1 * H:2 * H])
            g = jnp.tanh(gates[:, 2 * H:3 * H])
            o = jax.nn.sigmoid(gates[:, 3 * H:4 * H])
            c = f * c + i * g
            h = o * jnp.tanh(c)
            return (h, c), h

        h0 = jnp.zeros((B, H), jnp.float32)
        (_, _), hs = jax.lax.scan(step, (h0, h0), jnp.transpose(seq, (1, 0, 2)))
        seq = jnp.transpose(hs, (1, 0, 2))
    y = jnp.maximum(seq @ params["w1"].T + params["b1"], 0.0)
    y = jnp.maximum(y @ params["w2"].T + params["b2"], 0.0)
    return y


if __name__ == "__main__":
    # Small shapes consistent with the module's forward:
    #   input_seq: (batch=2, seq=8, input_size=1)
    #   hidden=32, dense=128, output_size=1, output_seq_len=1, lstm_layers=2
    B, T = 2, 8
    INPUT_SIZE, HIDDEN, DENSE = 1, 32, 128
    OUTPUT_SIZE, OUTPUT_SEQ_LEN, LSTM_LAYERS = 1, 1, 2

    key = jax.random.PRNGKey(0)
    key, k_x, k_p = jax.random.split(key, 3)

    params = init_params(k_p, INPUT_SIZE, HIDDEN, DENSE,
                         OUTPUT_SIZE, OUTPUT_SEQ_LEN, LSTM_LAYERS)
    x = jax.random.normal(k_x, (B, T, INPUT_SIZE), dtype=jnp.float32)

    packed = prepare_params(params)  # one-time weight packing (cached)
    fwd = jax.jit(functools.partial(admissions_lstm_forward, packed))

    out = fwd(x)
    jax.block_until_ready(out)

    assert out.shape == (B, T, OUTPUT_SIZE * OUTPUT_SEQ_LEN), out.shape
    assert bool(jnp.all(jnp.isfinite(out)))

    ref = reference_forward(params, x)
    max_err = float(jnp.max(jnp.abs(out - ref)))
    assert max_err < 5e-3, f"max abs error vs reference: {max_err}"

    print("KERNEL_OK")
</pallas_src>

<mosaic_0001>
module attributes {stable_mosaic.version = 11 : i64} {
  func.func @_fused_kernel(%arg0: i32, %arg1: memref<64x1xf32, #tpu.memory_space<vmem>>, %arg2: memref<1x128xf32, #tpu.memory_space<vmem>>, %arg3: memref<32x128xf32, #tpu.memory_space<vmem>>, %arg4: memref<1x128xf32, #tpu.memory_space<vmem>>, %arg5: memref<64x128xf32, #tpu.memory_space<vmem>>, %arg6: memref<1x128xf32, #tpu.memory_space<vmem>>, %arg7: memref<32x128xf32, #tpu.memory_space<vmem>>, %arg8: memref<1x128xf32, #tpu.memory_space<vmem>>, %arg9: memref<128x128xf32, #tpu.memory_space<vmem>>, %arg10: memref<1x128xf32, #tpu.memory_space<vmem>>, %arg11: memref<64x128xf32, #tpu.memory_space<vmem>>, %arg12: memref<64x32xf32, #tpu.memory_space<vmem>>) attributes {dimension_semantics = [#tpu.dimension_semantics<arbitrary>], iteration_bounds = array<i64: 1>, scalar_prefetch = 0 : i64, scratch_operands = 1 : i64, tpu.core_type = #tpu.core_type<tc>, window_params = [{pipeline_mode = #tpu.pipeline_mode<synchronous>, transform_indices = @transform_0, window_bounds = array<i64: 64, 1>}, {pipeline_mode = #tpu.pipeline_mode<synchronous>, transform_indices = @transform_1, window_bounds = array<i64: 1, 128>}, {pipeline_mode = #tpu.pipeline_mode<synchronous>, transform_indices = @transform_2, window_bounds = array<i64: 32, 128>}, {pipeline_mode = #tpu.pipeline_mode<synchronous>, transform_indices = @transform_3, window_bounds = array<i64: 1, 128>}, {pipeline_mode = #tpu.pipeline_mode<synchronous>, transform_indices = @transform_4, window_bounds = array<i64: 64, 128>}, {pipeline_mode = #tpu.pipeline_mode<synchronous>, transform_indices = @transform_5, window_bounds = array<i64: 1, 128>}, {pipeline_mode = #tpu.pipeline_mode<synchronous>, transform_indices = @transform_6, window_bounds = array<i64: 32, 128>}, {pipeline_mode = #tpu.pipeline_mode<synchronous>, transform_indices = @transform_7, window_bounds = array<i64: 1, 128>}, {pipeline_mode = #tpu.pipeline_mode<synchronous>, transform_indices = @transform_8, window_bounds = array<i64: 128, 128>}, {pipeline_mode = #tpu.pipeline_mode<synchronous>, transform_indices = @transform_9, window_bounds = array<i64: 1, 128>}, {pipeline_mode = #tpu.pipeline_mode<synchronous>, transform_indices = @transform_10, window_bounds = array<i64: 64, 128>}]} {
    %c0 = arith.constant 0 : index
    %c0_0 = arith.constant 0 : index
    %0 = vector.load %arg1[%c0, %c0_0] : memref<64x1xf32, #tpu.memory_space<vmem>>, vector<64x1xf32>
    %c0_1 = arith.constant 0 : index
    %c0_2 = arith.constant 0 : index
    %1 = vector.load %arg2[%c0_1, %c0_2] : memref<1x128xf32, #tpu.memory_space<vmem>>, vector<1x128xf32>
    %cst = arith.constant dense<0.000000e+00> : vector<64x128xf32>
    %2 = tpu.matmul %0, %1, %cst {dimension_numbers = #tpu.dot_dimension_numbers<[1], [0], [0], [1], [0, 0, 1, 1], [], []>} : vector<64x1xf32>, vector<1x128xf32>, vector<64x128xf32> -> vector<64x128xf32>
    %c0_3 = arith.constant 0 : index
    %c0_4 = arith.constant 0 : index
    %3 = vector.load %arg4[%c0_3, %c0_4] : memref<1x128xf32, #tpu.memory_space<vmem>>, vector<1x128xf32>
    %4 = vector.shape_cast %3 : vector<1x128xf32> to vector<1x128xf32>
    %5 = vector.broadcast %4 : vector<1x128xf32> to vector<64x128xf32>
    %6 = arith.addf %2, %5 : vector<64x128xf32>
    %c0_5 = arith.constant 0 : index
    %c0_6 = arith.constant 0 : index
    %7 = vector.load %arg3[%c0_5, %c0_6] : memref<32x128xf32, #tpu.memory_space<vmem>>, vector<32x128xf32>
    %c0_7 = arith.constant 0 : index
    %c0_8 = arith.constant 0 : index
    %8 = vector.load %arg5[%c0_7, %c0_8] : memref<64x128xf32, #tpu.memory_space<vmem>>, vector<64x128xf32>
    %c0_9 = arith.constant 0 : index
    %c0_10 = arith.constant 0 : index
    %9 = vector.load %arg6[%c0_9, %c0_10] : memref<1x128xf32, #tpu.memory_space<vmem>>, vector<1x128xf32>
    %10 = vector.shape_cast %9 : vector<1x128xf32> to vector<1x128xf32>
    %11 = vector.broadcast %10 : vector<1x128xf32> to vector<8x128xf32>
    %cst_11 = arith.constant 0.000000e+00 : f32
    %12 = vector.broadcast %cst_11 : f32 to vector<8x32xf32>
    %cst_12 = arith.constant 0.000000e+00 : f32
    %13 = vector.broadcast %cst_12 : f32 to vector<8x32xf32>
    %cst_13 = arith.constant 0.000000e+00 : f32
    %14 = vector.broadcast %cst_13 : f32 to vector<8x32xf32>
    %cst_14 = arith.constant 0.000000e+00 : f32
    %15 = vector.broadcast %cst_14 : f32 to vector<8x32xf32>
    %16 = vector.extract_strided_slice %6 {offsets = [0, 0], sizes = [8, 128], strides = [1, 1]} : vector<64x128xf32> to vector<8x128xf32>
    %cst_15 = arith.constant dense<0.000000e+00> : vector<8x128xf32>
    %17 = tpu.matmul %12, %7, %cst_15 {dimension_numbers = #tpu.dot_dimension_numbers<[1], [0], [0], [1], [0, 0, 1, 1], [], []>} : vector<8x32xf32>, vector<32x128xf32>, vector<8x128xf32> -> vector<8x128xf32>
    %18 = arith.addf %16, %17 : vector<8x128xf32>
    %19 = vector.extract_strided_slice %18 {offsets = [0, 0], sizes = [8, 32], strides = [1, 1]} : vector<8x128xf32> to vector<8x32xf32>
    %20 = arith.negf %19 : vector<8x32xf32>
    %21 = math.exp %20 : vector<8x32xf32>
    %cst_16 = arith.constant 1.000000e+00 : f32
    %22 = vector.broadcast %cst_16 : f32 to vector<8x32xf32>
    %23 = arith.addf %22, %21 : vector<8x32xf32>
    %24 = arith.divf %22, %23 : vector<8x32xf32>
    %25 = vector.extract_strided_slice %18 {offsets = [0, 32], sizes = [8, 32], strides = [1, 1]} : vector<8x128xf32> to vector<8x32xf32>
    %26 = arith.negf %25 : vector<8x32xf32>
    %27 = math.exp %26 : vector<8x32xf32>
    %cst_17 = arith.constant 1.000000e+00 : f32
    %28 = vector.broadcast %cst_17 : f32 to vector<8x32xf32>
    %29 = arith.addf %28, %27 : vector<8x32xf32>
    %30 = arith.divf %28, %29 : vector<8x32xf32>
    %31 = vector.extract_strided_slice %18 {offsets = [0, 64], sizes = [8, 32], strides = [1, 1]} : vector<8x128xf32> to vector<8x32xf32>
    %32 = math.tanh %31 : vector<8x32xf32>
    %33 = vector.extract_strided_slice %18 {offsets = [0, 96], sizes = [8, 32], strides = [1, 1]} : vector<8x128xf32> to vector<8x32xf32>
    %34 = arith.negf %33 : vector<8x32xf32>
    %35 = math.exp %34 : vector<8x32xf32>
    %cst_18 = arith.constant 1.000000e+00 : f32
    %36 = vector.broadcast %cst_18 : f32 to vector<8x32xf32>
    %37 = arith.addf %36, %35 : vector<8x32xf32>
    %38 = arith.divf %36, %37 : vector<8x32xf32>
    %39 = arith.mulf %30, %14 : vector<8x32xf32>
    %40 = arith.mulf %24, %32 : vector<8x32xf32>
    %41 = arith.addf %39, %40 : vector<8x32xf32>
    %42 = math.tanh %41 : vector<8x32xf32>
    %43 = arith.mulf %38, %42 : vector<8x32xf32>
    %44 = tpu.concatenate %43, %13 in 1 : vector<8x32xf32>, vector<8x32xf32> -> vector<8x64xf32>
    %cst_19 = arith.constant dense<0.000000e+00> : vector<8x128xf32>
    %45 = tpu.matmul %44, %8, %cst_19 {dimension_numbers = #tpu.dot_dimension_numbers<[1], [0], [0], [1], [0, 0, 1, 1], [], []>} : vector<8x64xf32>, vector<64x128xf32>, vector<8x128xf32> -> vector<8x128xf32>
    %46 = arith.addf %45, %11 : vector<8x128xf32>
    %47 = vector.extract_strided_slice %46 {offsets = [0, 0], sizes = [8, 32], strides = [1, 1]} : vector<8x128xf32> to vector<8x32xf32>
    %48 = arith.negf %47 : vector<8x32xf32>
    %49 = math.exp %48 : vector<8x32xf32>
    %cst_20 = arith.constant 1.000000e+00 : f32
    %50 = vector.broadcast %cst_20 : f32 to vector<8x32xf32>
    %51 = arith.addf %50, %49 : vector<8x32xf32>
    %52 = arith.divf %50, %51 : vector<8x32xf32>
    %53 = vector.extract_strided_slice %46 {offsets = [0, 32], sizes = [8, 32], strides = [1, 1]} : vector<8x128xf32> to vector<8x32xf32>
    %54 = arith.negf %53 : vector<8x32xf32>
    %55 = math.exp %54 : vector<8x32xf32>
    %cst_21 = arith.constant 1.000000e+00 : f32
    %56 = vector.broadcast %cst_21 : f32 to vector<8x32xf32>
    %57 = arith.addf %56, %55 : vector<8x32xf32>
    %58 = arith.divf %56, %57 : vector<8x32xf32>
    %59 = vector.extract_strided_slice %46 {offsets = [0, 64], sizes = [8, 32], strides = [1, 1]} : vector<8x128xf32> to vector<8x32xf32>
    %60 = math.tanh %59 : vector<8x32xf32>
    %61 = vector.extract_strided_slice %46 {offsets = [0, 96], sizes = [8, 32], strides = [1, 1]} : vector<8x128xf32> to vector<8x32xf32>
    %62 = arith.negf %61 : vector<8x32xf32>
    %63 = math.exp %62 : vector<8x32xf32>
    %cst_22 = arith.constant 1.000000e+00 : f32
    %64 = vector.broadcast %cst_22 : f32 to vector<8x32xf32>
    %65 = arith.addf %64, %63 : vector<8x32xf32>
    %66 = arith.divf %64, %65 : vector<8x32xf32>
    %67 = arith.mulf %58, %15 : vector<8x32xf32>
    %68 = arith.mulf %52, %60 : vector<8x32xf32>
    %69 = arith.addf %67, %68 : vector<8x32xf32>
    %70 = math.tanh %69 : vector<8x32xf32>
    %71 = arith.mulf %66, %70 : vector<8x32xf32>
    %c0_23 = arith.constant 0 : index
    %c0_24 = arith.constant 0 : index
    %72 = vector.load %arg12[%c0_23, %c0_24] : memref<64x32xf32, #tpu.memory_space<vmem>>, vector<8x32xf32>
    tpu.vector_store %arg12[%c0_23, %c0_24], %71 {strides = array<i32>} : memref<64x32xf32, #tpu.memory_space<vmem>>, vector<8x32xf32>,
    %73 = vector.extract_strided_slice %6 {offsets = [8, 0], sizes = [8, 128], strides = [1, 1]} : vector<64x128xf32> to vector<8x128xf32>
    %cst_25 = arith.constant dense<0.000000e+00> : vector<8x128xf32>
    %74 = tpu.matmul %43, %7, %cst_25 {dimension_numbers = #tpu.dot_dimension_numbers<[1], [0], [0], [1], [0, 0, 1, 1], [], []>} : vector<8x32xf32>, vector<32x128xf32>, vector<8x128xf32> -> vector<8x128xf32>
    %75 = arith.addf %73, %74 : vector<8x128xf32>
    %76 = vector.extract_strided_slice %75 {offsets = [0, 0], sizes = [8, 32], strides = [1, 1]} : vector<8x128xf32> to vector<8x32xf32>
    %77 = arith.negf %76 : vector<8x32xf32>
    %78 = math.exp %77 : vector<8x32xf32>
    %cst_26 = arith.constant 1.000000e+00 : f32
    %79 = vector.broadcast %cst_26 : f32 to vector<8x32xf32>
    %80 = arith.addf %79, %78 : vector<8x32xf32>
    %81 = arith.divf %79, %80 : vector<8x32xf32>
    %82 = vector.extract_strided_slice %75 {offsets = [0, 32], sizes = [8, 32], strides = [1, 1]} : vector<8x128xf32> to vector<8x32xf32>
    %83 = arith.negf %82 : vector<8x32xf32>
    %84 = math.exp %83 : vector<8x32xf32>
    %cst_27 = arith.constant 1.000000e+00 : f32
    %85 = vector.broadcast %cst_27 : f32 to vector<8x32xf32>
    %86 = arith.addf %85, %84 : vector<8x32xf32>
    %87 = arith.divf %85, %86 : vector<8x32xf32>
    %88 = vector.extract_strided_slice %75 {offsets = [0, 64], sizes = [8, 32], strides = [1, 1]} : vector<8x128xf32> to vector<8x32xf32>
    %89 = math.tanh %88 : vector<8x32xf32>
    %90 = vector.extract_strided_slice %75 {offsets = [0, 96], sizes = [8, 32], strides = [1, 1]} : vector<8x128xf32> to vector<8x32xf32>
    %91 = arith.negf %90 : vector<8x32xf32>
    %92 = math.exp %91 : vector<8x32xf32>
    %cst_28 = arith.constant 1.000000e+00 : f32
    %93 = vector.broadcast %cst_28 : f32 to vector<8x32xf32>
    %94 = arith.addf %93, %92 : vector<8x32xf32>
    %95 = arith.divf %93, %94 : vector<8x32xf32>
    %96 = arith.mulf %87, %41 : vector<8x32xf32>
    %97 = arith.mulf %81, %89 : vector<8x32xf32>
    %98 = arith.addf %96, %97 : vector<8x32xf32>
    %99 = math.tanh %98 : vector<8x32xf32>
    %100 = arith.mulf %95, %99 : vector<8x32xf32>
    %101 = tpu.concatenate %100, %71 in 1 : vector<8x32xf32>, vector<8x32xf32> -> vector<8x64xf32>
    %cst_29 = arith.constant dense<0.000000e+00> : vector<8x128xf32>
    %102 = tpu.matmul %101, %8, %cst_29 {dimension_numbers = #tpu.dot_dimension_numbers<[1], [0], [0], [1], [0, 0, 1, 1], [], []>} : vector<8x64xf32>, vector<64x128xf32>, vector<8x128xf32> -> vector<8x128xf32>
    %103 = arith.addf %102, %11 : vector<8x128xf32>
    %104 = vector.extract_strided_slice %103 {offsets = [0, 0], sizes = [8, 32], strides = [1, 1]} : vector<8x128xf32> to vector<8x32xf32>
    %105 = arith.negf %104 : vector<8x32xf32>
    %106 = math.exp %105 : vector<8x32xf32>
    %cst_30 = arith.constant 1.000000e+00 : f32
    %107 = vector.broadcast %cst_30 : f32 to vector<8x32xf32>
    %108 = arith.addf %107, %106 : vector<8x32xf32>
    %109 = arith.divf %107, %108 : vector<8x32xf32>
    %110 = vector.extract_strided_slice %103 {offsets = [0, 32], sizes = [8, 32], strides = [1, 1]} : vector<8x128xf32> to vector<8x32xf32>
    %111 = arith.negf %110 : vector<8x32xf32>
    %112 = math.exp %111 : vector<8x32xf32>
    %cst_31 = arith.constant 1.000000e+00 : f32
    %113 = vector.broadcast %cst_31 : f32 to vector<8x32xf32>
    %114 = arith.addf %113, %112 : vector<8x32xf32>
    %115 = arith.divf %113, %114 : vector<8x32xf32>
    %116 = vector.extract_strided_slice %103 {offsets = [0, 64], sizes = [8, 32], strides = [1, 1]} : vector<8x128xf32> to vector<8x32xf32>
    %117 = math.tanh %116 : vector<8x32xf32>
    %118 = vector.extract_strided_slice %103 {offsets = [0, 96], sizes = [8, 32], strides = [1, 1]} : vector<8x128xf32> to vector<8x32xf32>
    %119 = arith.negf %118 : vector<8x32xf32>
    %120 = math.exp %119 : vector<8x32xf32>
    %cst_32 = arith.constant 1.000000e+00 : f32
    %121 = vector.broadcast %cst_32 : f32 to vector<8x32xf32>
    %122 = arith.addf %121, %120 : vector<8x32xf32>
    %123 = arith.divf %121, %122 : vector<8x32xf32>
    %124 = arith.mulf %115, %69 : vector<8x32xf32>
    %125 = arith.mulf %109, %117 : vector<8x32xf32>
    %126 = arith.addf %124, %125 : vector<8x32xf32>
    %127 = math.tanh %126 : vector<8x32xf32>
    %128 = arith.mulf %123, %127 : vector<8x32xf32>
    %c8 = arith.constant 8 : index
    %c0_33 = arith.constant 0 : index
    %129 = vector.load %arg12[%c8, %c0_33] : memref<64x32xf32, #tpu.memory_space<vmem>>, vector<8x32xf32>
    tpu.vector_store %arg12[%c8, %c0_33], %128 {strides = array<i32>} : memref<64x32xf32, #tpu.memory_space<vmem>>, vector<8x32xf32>,
    %130 = vector.extract_strided_slice %6 {offsets = [16, 0], sizes = [8, 128], strides = [1, 1]} : vector<64x128xf32> to vector<8x128xf32>
    %cst_34 = arith.constant dense<0.000000e+00> : vector<8x128xf32>
    %131 = tpu.matmul %100, %7, %cst_34 {dimension_numbers = #tpu.dot_dimension_numbers<[1], [0], [0], [1], [0, 0, 1, 1], [], []>} : vector<8x32xf32>, vector<32x128xf32>, vector<8x128xf32> -> vector<8x128xf32>
    %132 = arith.addf %130, %131 : vector<8x128xf32>
    %133 = vector.extract_strided_slice %132 {offsets = [0, 0], sizes = [8, 32], strides = [1, 1]} : vector<8x128xf32> to vector<8x32xf32>
    %134 = arith.negf %133 : vector<8x32xf32>
    %135 = math.exp %134 : vector<8x32xf32>
    %cst_35 = arith.constant 1.000000e+00 : f32
    %136 = vector.broadcast %cst_35 : f32 to vector<8x32xf32>
    %137 = arith.addf %136, %135 : vector<8x32xf32>
    %138 = arith.divf %136, %137 : vector<8x32xf32>
    %139 = vector.extract_strided_slice %132 {offsets = [0, 32], sizes = [8, 32], strides = [1, 1]} : vector<8x128xf32> to vector<8x32xf32>
    %140 = arith.negf %139 : vector<8x32xf32>
    %141 = math.exp %140 : vector<8x32xf32>
    %cst_36 = arith.constant 1.000000e+00 : f32
    %142 = vector.broadcast %cst_36 : f32 to vector<8x32xf32>
    %143 = arith.addf %142, %141 : vector<8x32xf32>
    %144 = arith.divf %142, %143 : vector<8x32xf32>
    %145 = vector.extract_strided_slice %132 {offsets = [0, 64], sizes = [8, 32], strides = [1, 1]} : vector<8x128xf32> to vector<8x32xf32>
    %146 = math.tanh %145 : vector<8x32xf32>
    %147 = vector.extract_strided_slice %132 {offsets = [0, 96], sizes = [8, 32], strides = [1, 1]} : vector<8x128xf32> to vector<8x32xf32>
    %148 = arith.negf %147 : vector<8x32xf32>
    %149 = math.exp %148 : vector<8x32xf32>
    %cst_37 = arith.constant 1.000000e+00 : f32
    %150 = vector.broadcast %cst_37 : f32 to vector<8x32xf32>
    %151 = arith.addf %150, %149 : vector<8x32xf32>
    %152 = arith.divf %150, %151 : vector<8x32xf32>
    %153 = arith.mulf %144, %98 : vector<8x32xf32>
    %154 = arith.mulf %138, %146 : vector<8x32xf32>
    %155 = arith.addf %153, %154 : vector<8x32xf32>
    %156 = math.tanh %155 : vector<8x32xf32>
    %157 = arith.mulf %152, %156 : vector<8x32xf32>
    %158 = tpu.concatenate %157, %128 in 1 : vector<8x32xf32>, vector<8x32xf32> -> vector<8x64xf32>
    %cst_38 = arith.constant dense<0.000000e+00> : vector<8x128xf32>
    %159 = tpu.matmul %158, %8, %cst_38 {dimension_numbers = #tpu.dot_dimension_numbers<[1], [0], [0], [1], [0, 0, 1, 1], [], []>} : vector<8x64xf32>, vector<64x128xf32>, vector<8x128xf32> -> vector<8x128xf32>
    %160 = arith.addf %159, %11 : vector<8x128xf32>
    %161 = vector.extract_strided_slice %160 {offsets = [0, 0], sizes = [8, 32], strides = [1, 1]} : vector<8x128xf32> to vector<8x32xf32>
    %162 = arith.negf %161 : vector<8x32xf32>
    %163 = math.exp %162 : vector<8x32xf32>
    %cst_39 = arith.constant 1.000000e+00 : f32
    %164 = vector.broadcast %cst_39 : f32 to vector<8x32xf32>
    %165 = arith.addf %164, %163 : vector<8x32xf32>
    %166 = arith.divf %164, %165 : vector<8x32xf32>
    %167 = vector.extract_strided_slice %160 {offsets = [0, 32], sizes = [8, 32], strides = [1, 1]} : vector<8x128xf32> to vector<8x32xf32>
    %168 = arith.negf %167 : vector<8x32xf32>
    %169 = math.exp %168 : vector<8x32xf32>
    %cst_40 = arith.constant 1.000000e+00 : f32
    %170 = vector.broadcast %cst_40 : f32 to vector<8x32xf32>
    %171 = arith.addf %170, %169 : vector<8x32xf32>
    %172 = arith.divf %170, %171 : vector<8x32xf32>
    %173 = vector.extract_strided_slice %160 {offsets = [0, 64], sizes = [8, 32], strides = [1, 1]} : vector<8x128xf32> to vector<8x32xf32>
    %174 = math.tanh %173 : vector<8x32xf32>
    %175 = vector.extract_strided_slice %160 {offsets = [0, 96], sizes = [8, 32], strides = [1, 1]} : vector<8x128xf32> to vector<8x32xf32>
    %176 = arith.negf %175 : vector<8x32xf32>
    %177 = math.exp %176 : vector<8x32xf32>
    %cst_41 = arith.constant 1.000000e+00 : f32
    %178 = vector.broadcast %cst_41 : f32 to vector<8x32xf32>
    %179 = arith.addf %178, %177 : vector<8x32xf32>
    %180 = arith.divf %178, %179 : vector<8x32xf32>
    %181 = arith.mulf %172, %126 : vector<8x32xf32>
    %182 = arith.mulf %166, %174 : vector<8x32xf32>
    %183 = arith.addf %181, %182 : vector<8x32xf32>
    %184 = math.tanh %183 : vector<8x32xf32>
    %185 = arith.mulf %180, %184 : vector<8x32xf32>
    %c16 = arith.constant 16 : index
    %c0_42 = arith.constant 0 : index
    %186 = vector.load %arg12[%c16, %c0_42] : memref<64x32xf32, #tpu.memory_space<vmem>>, vector<8x32xf32>
    tpu.vector_store %arg12[%c16, %c0_42], %185 {strides = array<i32>} : memref<64x32xf32, #tpu.memory_space<vmem>>, vector<8x32xf32>,
    %187 = vector.extract_strided_slice %6 {offsets = [24, 0], sizes = [8, 128], strides = [1, 1]} : vector<64x128xf32> to vector<8x128xf32>
    %cst_43 = arith.constant dense<0.000000e+00> : vector<8x128xf32>
    %188 = tpu.matmul %157, %7, %cst_43 {dimension_numbers = #tpu.dot_dimension_numbers<[1], [0], [0], [1], [0, 0, 1, 1], [], []>} : vector<8x32xf32>, vector<32x128xf32>, vector<8x128xf32> -> vector<8x128xf32>
    %189 = arith.addf %187, %188 : vector<8x128xf32>
    %190 = vector.extract_strided_slice %189 {offsets = [0, 0], sizes = [8, 32], strides = [1, 1]} : vector<8x128xf32> to vector<8x32xf32>
    %191 = arith.negf %190 : vector<8x32xf32>
    %192 = math.exp %191 : vector<8x32xf32>
    %cst_44 = arith.constant 1.000000e+00 : f32
    %193 = vector.broadcast %cst_44 : f32 to vector<8x32xf32>
    %194 = arith.addf %193, %192 : vector<8x32xf32>
    %195 = arith.divf %193, %194 : vector<8x32xf32>
    %196 = vector.extract_strided_slice %189 {offsets = [0, 32], sizes = [8, 32], strides = [1, 1]} : vector<8x128xf32> to vector<8x32xf32>
    %197 = arith.negf %196 : vector<8x32xf32>
    %198 = math.exp %197 : vector<8x32xf32>
    %cst_45 = arith.constant 1.000000e+00 : f32
    %199 = vector.broadcast %cst_45 : f32 to vector<8x32xf32>
    %200 = arith.addf %199, %198 : vector<8x32xf32>
    %201 = arith.divf %199, %200 : vector<8x32xf32>
    %202 = vector.extract_strided_slice %189 {offsets = [0, 64], sizes = [8, 32], strides = [1, 1]} : vector<8x128xf32> to vector<8x32xf32>
    %203 = math.tanh %202 : vector<8x32xf32>
    %204 = vector.extract_strided_slice %189 {offsets = [0, 96], sizes = [8, 32], strides = [1, 1]} : vector<8x128xf32> to vector<8x32xf32>
    %205 = arith.negf %204 : vector<8x32xf32>
    %206 = math.exp %205 : vector<8x32xf32>
    %cst_46 = arith.constant 1.000000e+00 : f32
    %207 = vector.broadcast %cst_46 : f32 to vector<8x32xf32>
    %208 = arith.addf %207, %206 : vector<8x32xf32>
    %209 = arith.divf %207, %208 : vector<8x32xf32>
    %210 = arith.mulf %201, %155 : vector<8x32xf32>
    %211 = arith.mulf %195, %203 : vector<8x32xf32>
    %212 = arith.addf %210, %211 : vector<8x32xf32>
    %213 = math.tanh %212 : vector<8x32xf32>
    %214 = arith.mulf %209, %213 : vector<8x32xf32>
    %215 = tpu.concatenate %214, %185 in 1 : vector<8x32xf32>, vector<8x32xf32> -> vector<8x64xf32>
    %cst_47 = arith.constant dense<0.000000e+00> : vector<8x128xf32>
    %216 = tpu.matmul %215, %8, %cst_47 {dimension_numbers = #tpu.dot_dimension_numbers<[1], [0], [0], [1], [0, 0, 1, 1], [], []>} : vector<8x64xf32>, vector<64x128xf32>, vector<8x128xf32> -> vector<8x128xf32>
    %217 = arith.addf %216, %11 : vector<8x128xf32>
    %218 = vector.extract_strided_slice %217 {offsets = [0, 0], sizes = [8, 32], strides = [1, 1]} : vector<8x128xf32> to vector<8x32xf32>
    %219 = arith.negf %218 : vector<8x32xf32>
    %220 = math.exp %219 : vector<8x32xf32>
    %cst_48 = arith.constant 1.000000e+00 : f32
    %221 = vector.broadcast %cst_48 : f32 to vector<8x32xf32>
    %222 = arith.addf %221, %220 : vector<8x32xf32>
    %223 = arith.divf %221, %222 : vector<8x32xf32>
    %224 = vector.extract_strided_slice %217 {offsets = [0, 32], sizes = [8, 32], strides = [1, 1]} : vector<8x128xf32> to vector<8x32xf32>
    %225 = arith.negf %224 : vector<8x32xf32>
    %226 = math.exp %225 : vector<8x32xf32>
    %cst_49 = arith.constant 1.000000e+00 : f32
    %227 = vector.broadcast %cst_49 : f32 to vector<8x32xf32>
    %228 = arith.addf %227, %226 : vector<8x32xf32>
    %229 = arith.divf %227, %228 : vector<8x32xf32>
    %230 = vector.extract_strided_slice %217 {offsets = [0, 64], sizes = [8, 32], strides = [1, 1]} : vector<8x128xf32> to vector<8x32xf32>
    %231 = math.tanh %230 : vector<8x32xf32>
    %232 = vector.extract_strided_slice %217 {offsets = [0, 96], sizes = [8, 32], strides = [1, 1]} : vector<8x128xf32> to vector<8x32xf32>
    %233 = arith.negf %232 : vector<8x32xf32>
    %234 = math.exp %233 : vector<8x32xf32>
    %cst_50 = arith.constant 1.000000e+00 : f32
    %235 = vector.broadcast %cst_50 : f32 to vector<8x32xf32>
    %236 = arith.addf %235, %234 : vector<8x32xf32>
    %237 = arith.divf %235, %236 : vector<8x32xf32>
    %238 = arith.mulf %229, %183 : vector<8x32xf32>
    %239 = arith.mulf %223, %231 : vector<8x32xf32>
    %240 = arith.addf %238, %239 : vector<8x32xf32>
    %241 = math.tanh %240 : vector<8x32xf32>
    %242 = arith.mulf %237, %241 : vector<8x32xf32>
    %c24 = arith.constant 24 : index
    %c0_51 = arith.constant 0 : index
    %243 = vector.load %arg12[%c24, %c0_51] : memref<64x32xf32, #tpu.memory_space<vmem>>, vector<8x32xf32>
    tpu.vector_store %arg12[%c24, %c0_51], %242 {strides = array<i32>} : memref<64x32xf32, #tpu.memory_space<vmem>>, vector<8x32xf32>,
    %244 = vector.extract_strided_slice %6 {offsets = [32, 0], sizes = [8, 128], strides = [1, 1]} : vector<64x128xf32> to vector<8x128xf32>
    %cst_52 = arith.constant dense<0.000000e+00> : vector<8x128xf32>
    %245 = tpu.matmul %214, %7, %cst_52 {dimension_numbers = #tpu.dot_dimension_numbers<[1], [0], [0], [1], [0, 0, 1, 1], [], []>} : vector<8x32xf32>, vector<32x128xf32>, vector<8x128xf32> -> vector<8x128xf32>
    %246 = arith.addf %244, %245 : vector<8x128xf32>
    %247 = vector.extract_strided_slice %246 {offsets = [0, 0], sizes = [8, 32], strides = [1, 1]} : vector<8x128xf32> to vector<8x32xf32>
    %248 = arith.negf %247 : vector<8x32xf32>
    %249 = math.exp %248 : vector<8x32xf32>
    %cst_53 = arith.constant 1.000000e+00 : f32
    %250 = vector.broadcast %cst_53 : f32 to vector<8x32xf32>
    %251 = arith.addf %250, %249 : vector<8x32xf32>
    %252 = arith.divf %250, %251 : vector<8x32xf32>
    %253 = vector.extract_strided_slice %246 {offsets = [0, 32], sizes = [8, 32], strides = [1, 1]} : vector<8x128xf32> to vector<8x32xf32>
    %254 = arith.negf %253 : vector<8x32xf32>
    %255 = math.exp %254 : vector<8x32xf32>
    %cst_54 = arith.constant 1.000000e+00 : f32
    %256 = vector.broadcast %cst_54 : f32 to vector<8x32xf32>
    %257 = arith.addf %256, %255 : vector<8x32xf32>
    %258 = arith.divf %256, %257 : vector<8x32xf32>
    %259 = vector.extract_strided_slice %246 {offsets = [0, 64], sizes = [8, 32], strides = [1, 1]} : vector<8x128xf32> to vector<8x32xf32>
    %260 = math.tanh %259 : vector<8x32xf32>
    %261 = vector.extract_strided_slice %246 {offsets = [0, 96], sizes = [8, 32], strides = [1, 1]} : vector<8x128xf32> to vector<8x32xf32>
    %262 = arith.negf %261 : vector<8x32xf32>
    %263 = math.exp %262 : vector<8x32xf32>
    %cst_55 = arith.constant 1.000000e+00 : f32
    %264 = vector.broadcast %cst_55 : f32 to vector<8x32xf32>
    %265 = arith.addf %264, %263 : vector<8x32xf32>
    %266 = arith.divf %264, %265 : vector<8x32xf32>
    %267 = arith.mulf %258, %212 : vector<8x32xf32>
    %268 = arith.mulf %252, %260 : vector<8x32xf32>
    %269 = arith.addf %267, %268 : vector<8x32xf32>
    %270 = math.tanh %269 : vector<8x32xf32>
    %271 = arith.mulf %266, %270 : vector<8x32xf32>
    %272 = tpu.concatenate %271, %242 in 1 : vector<8x32xf32>, vector<8x32xf32> -> vector<8x64xf32>
    %cst_56 = arith.constant dense<0.000000e+00> : vector<8x128xf32>
    %273 = tpu.matmul %272, %8, %cst_56 {dimension_numbers = #tpu.dot_dimension_numbers<[1], [0], [0], [1], [0, 0, 1, 1], [], []>} : vector<8x64xf32>, vector<64x128xf32>, vector<8x128xf32> -> vector<8x128xf32>
    %274 = arith.addf %273, %11 : vector<8x128xf32>
    %275 = vector.extract_strided_slice %274 {offsets = [0, 0], sizes = [8, 32], strides = [1, 1]} : vector<8x128xf32> to vector<8x32xf32>
    %276 = arith.negf %275 : vector<8x32xf32>
    %277 = math.exp %276 : vector<8x32xf32>
    %cst_57 = arith.constant 1.000000e+00 : f32
    %278 = vector.broadcast %cst_57 : f32 to vector<8x32xf32>
    %279 = arith.addf %278, %277 : vector<8x32xf32>
    %280 = arith.divf %278, %279 : vector<8x32xf32>
    %281 = vector.extract_strided_slice %274 {offsets = [0, 32], sizes = [8, 32], strides = [1, 1]} : vector<8x128xf32> to vector<8x32xf32>
    %282 = arith.negf %281 : vector<8x32xf32>
    %283 = math.exp %282 : vector<8x32xf32>
    %cst_58 = arith.constant 1.000000e+00 : f32
    %284 = vector.broadcast %cst_58 : f32 to vector<8x32xf32>
    %285 = arith.addf %284, %283 : vector<8x32xf32>
    %286 = arith.divf %284, %285 : vector<8x32xf32>
    %287 = vector.extract_strided_slice %274 {offsets = [0, 64], sizes = [8, 32], strides = [1, 1]} : vector<8x128xf32> to vector<8x32xf32>
    %288 = math.tanh %287 : vector<8x32xf32>
    %289 = vector.extract_strided_slice %274 {offsets = [0, 96], sizes = [8, 32], strides = [1, 1]} : vector<8x128xf32> to vector<8x32xf32>
    %290 = arith.negf %289 : vector<8x32xf32>
    %291 = math.exp %290 : vector<8x32xf32>
    %cst_59 = arith.constant 1.000000e+00 : f32
    %292 = vector.broadcast %cst_59 : f32 to vector<8x32xf32>
    %293 = arith.addf %292, %291 : vector<8x32xf32>
    %294 = arith.divf %292, %293 : vector<8x32xf32>
    %295 = arith.mulf %286, %240 : vector<8x32xf32>
    %296 = arith.mulf %280, %288 : vector<8x32xf32>
    %297 = arith.addf %295, %296 : vector<8x32xf32>
    %298 = math.tanh %297 : vector<8x32xf32>
    %299 = arith.mulf %294, %298 : vector<8x32xf32>
    %c32 = arith.constant 32 : index
    %c0_60 = arith.constant 0 : index
    %300 = vector.load %arg12[%c32, %c0_60] : memref<64x32xf32, #tpu.memory_space<vmem>>, vector<8x32xf32>
    tpu.vector_store %arg12[%c32, %c0_60], %299 {strides = array<i32>} : memref<64x32xf32, #tpu.memory_space<vmem>>, vector<8x32xf32>,
    %301 = vector.extract_strided_slice %6 {offsets = [40, 0], sizes = [8, 128], strides = [1, 1]} : vector<64x128xf32> to vector<8x128xf32>
    %cst_61 = arith.constant dense<0.000000e+00> : vector<8x128xf32>
    %302 = tpu.matmul %271, %7, %cst_61 {dimension_numbers = #tpu.dot_dimension_numbers<[1], [0], [0], [1], [0, 0, 1, 1], [], []>} : vector<8x32xf32>, vector<32x128xf32>, vector<8x128xf32> -> vector<8x128xf32>
    %303 = arith.addf %301, %302 : vector<8x128xf32>
    %304 = vector.extract_strided_slice %303 {offsets = [0, 0], sizes = [8, 32], strides = [1, 1]} : vector<8x128xf32> to vector<8x32xf32>
    %305 = arith.negf %304 : vector<8x32xf32>
    %306 = math.exp %305 : vector<8x32xf32>
    %cst_62 = arith.constant 1.000000e+00 : f32
    %307 = vector.broadcast %cst_62 : f32 to vector<8x32xf32>
    %308 = arith.addf %307, %306 : vector<8x32xf32>
    %309 = arith.divf %307, %308 : vector<8x32xf32>
    %310 = vector.extract_strided_slice %303 {offsets = [0, 32], sizes = [8, 32], strides = [1, 1]} : vector<8x128xf32> to vector<8x32xf32>
    %311 = arith.negf %310 : vector<8x32xf32>
    %312 = math.exp %311 : vector<8x32xf32>
    %cst_63 = arith.constant 1.000000e+00 : f32
    %313 = vector.broadcast %cst_63 : f32 to vector<8x32xf32>
    %314 = arith.addf %313, %312 : vector<8x32xf32>
    %315 = arith.divf %313, %314 : vector<8x32xf32>
    %316 = vector.extract_strided_slice %303 {offsets = [0, 64], sizes = [8, 32], strides = [1, 1]} : vector<8x128xf32> to vector<8x32xf32>
    %317 = math.tanh %316 : vector<8x32xf32>
    %318 = vector.extract_strided_slice %303 {offsets = [0, 96], sizes = [8, 32], strides = [1, 1]} : vector<8x128xf32> to vector<8x32xf32>
    %319 = arith.negf %318 : vector<8x32xf32>
    %320 = math.exp %319 : vector<8x32xf32>
    %cst_64 = arith.constant 1.000000e+00 : f32
    %321 = vector.broadcast %cst_64 : f32 to vector<8x32xf32>
    %322 = arith.addf %321, %320 : vector<8x32xf32>
    %323 = arith.divf %321, %322 : vector<8x32xf32>
    %324 = arith.mulf %315, %269 : vector<8x32xf32>
    %325 = arith.mulf %309, %317 : vector<8x32xf32>
    %326 = arith.addf %324, %325 : vector<8x32xf32>
    %327 = math.tanh %326 : vector<8x32xf32>
    %328 = arith.mulf %323, %327 : vector<8x32xf32>
    %329 = tpu.concatenate %328, %299 in 1 : vector<8x32xf32>, vector<8x32xf32> -> vector<8x64xf32>
    %cst_65 = arith.constant dense<0.000000e+00> : vector<8x128xf32>
    %330 = tpu.matmul %329, %8, %cst_65 {dimension_numbers = #tpu.dot_dimension_numbers<[1], [0], [0], [1], [0, 0, 1, 1], [], []>} : vector<8x64xf32>, vector<64x128xf32>, vector<8x128xf32> -> vector<8x128xf32>
    %331 = arith.addf %330, %11 : vector<8x128xf32>
    %332 = vector.extract_strided_slice %331 {offsets = [0, 0], sizes = [8, 32], strides = [1, 1]} : vector<8x128xf32> to vector<8x32xf32>
    %333 = arith.negf %332 : vector<8x32xf32>
    %334 = math.exp %333 : vector<8x32xf32>
    %cst_66 = arith.constant 1.000000e+00 : f32
    %335 = vector.broadcast %cst_66 : f32 to vector<8x32xf32>
    %336 = arith.addf %335, %334 : vector<8x32xf32>
    %337 = arith.divf %335, %336 : vector<8x32xf32>
    %338 = vector.extract_strided_slice %331 {offsets = [0, 32], sizes = [8, 32], strides = [1, 1]} : vector<8x128xf32> to vector<8x32xf32>
    %339 = arith.negf %338 : vector<8x32xf32>
    %340 = math.exp %339 : vector<8x32xf32>
    %cst_67 = arith.constant 1.000000e+00 : f32
    %341 = vector.broadcast %cst_67 : f32 to vector<8x32xf32>
    %342 = arith.addf %341, %340 : vector<8x32xf32>
    %343 = arith.divf %341, %342 : vector<8x32xf32>
    %344 = vector.extract_strided_slice %331 {offsets = [0, 64], sizes = [8, 32], strides = [1, 1]} : vector<8x128xf32> to vector<8x32xf32>
    %345 = math.tanh %344 : vector<8x32xf32>
    %346 = vector.extract_strided_slice %331 {offsets = [0, 96], sizes = [8, 32], strides = [1, 1]} : vector<8x128xf32> to vector<8x32xf32>
    %347 = arith.negf %346 : vector<8x32xf32>
    %348 = math.exp %347 : vector<8x32xf32>
    %cst_68 = arith.constant 1.000000e+00 : f32
    %349 = vector.broadcast %cst_68 : f32 to vector<8x32xf32>
    %350 = arith.addf %349, %348 : vector<8x32xf32>
    %351 = arith.divf %349, %350 : vector<8x32xf32>
    %352 = arith.mulf %343, %297 : vector<8x32xf32>
    %353 = arith.mulf %337, %345 : vector<8x32xf32>
    %354 = arith.addf %352, %353 : vector<8x32xf32>
    %355 = math.tanh %354 : vector<8x32xf32>
    %356 = arith.mulf %351, %355 : vector<8x32xf32>
    %c40 = arith.constant 40 : index
    %c0_69 = arith.constant 0 : index
    %357 = vector.load %arg12[%c40, %c0_69] : memref<64x32xf32, #tpu.memory_space<vmem>>, vector<8x32xf32>
    tpu.vector_store %arg12[%c40, %c0_69], %356 {strides = array<i32>} : memref<64x32xf32, #tpu.memory_space<vmem>>, vector<8x32xf32>,
    %358 = vector.extract_strided_slice %6 {offsets = [48, 0], sizes = [8, 128], strides = [1, 1]} : vector<64x128xf32> to vector<8x128xf32>
    %cst_70 = arith.constant dense<0.000000e+00> : vector<8x128xf32>
    %359 = tpu.matmul %328, %7, %cst_70 {dimension_numbers = #tpu.dot_dimension_numbers<[1], [0], [0], [1], [0, 0, 1, 1], [], []>} : vector<8x32xf32>, vector<32x128xf32>, vector<8x128xf32> -> vector<8x128xf32>
    %360 = arith.addf %358, %359 : vector<8x128xf32>
    %361 = vector.extract_strided_slice %360 {offsets = [0, 0], sizes = [8, 32], strides = [1, 1]} : vector<8x128xf32> to vector<8x32xf32>
    %362 = arith.negf %361 : vector<8x32xf32>
    %363 = math.exp %362 : vector<8x32xf32>
    %cst_71 = arith.constant 1.000000e+00 : f32
    %364 = vector.broadcast %cst_71 : f32 to vector<8x32xf32>
    %365 = arith.addf %364, %363 : vector<8x32xf32>
    %366 = arith.divf %364, %365 : vector<8x32xf32>
    %367 = vector.extract_strided_slice %360 {offsets = [0, 32], sizes = [8, 32], strides = [1, 1]} : vector<8x128xf32> to vector<8x32xf32>
    %368 = arith.negf %367 : vector<8x32xf32>
    %369 = math.exp %368 : vector<8x32xf32>
    %cst_72 = arith.constant 1.000000e+00 : f32
    %370 = vector.broadcast %cst_72 : f32 to vector<8x32xf32>
    %371 = arith.addf %370, %369 : vector<8x32xf32>
    %372 = arith.divf %370, %371 : vector<8x32xf32>
    %373 = vector.extract_strided_slice %360 {offsets = [0, 64], sizes = [8, 32], strides = [1, 1]} : vector<8x128xf32> to vector<8x32xf32>
    %374 = math.tanh %373 : vector<8x32xf32>
    %375 = vector.extract_strided_slice %360 {offsets = [0, 96], sizes = [8, 32], strides = [1, 1]} : vector<8x128xf32> to vector<8x32xf32>
    %376 = arith.negf %375 : vector<8x32xf32>
    %377 = math.exp %376 : vector<8x32xf32>
    %cst_73 = arith.constant 1.000000e+00 : f32
    %378 = vector.broadcast %cst_73 : f32 to vector<8x32xf32>
    %379 = arith.addf %378, %377 : vector<8x32xf32>
    %380 = arith.divf %378, %379 : vector<8x32xf32>
    %381 = arith.mulf %372, %326 : vector<8x32xf32>
    %382 = arith.mulf %366, %374 : vector<8x32xf32>
    %383 = arith.addf %381, %382 : vector<8x32xf32>
    %384 = math.tanh %383 : vector<8x32xf32>
    %385 = arith.mulf %380, %384 : vector<8x32xf32>
    %386 = tpu.concatenate %385, %356 in 1 : vector<8x32xf32>, vector<8x32xf32> -> vector<8x64xf32>
    %cst_74 = arith.constant dense<0.000000e+00> : vector<8x128xf32>
    %387 = tpu.matmul %386, %8, %cst_74 {dimension_numbers = #tpu.dot_dimension_numbers<[1], [0], [0], [1], [0, 0, 1, 1], [], []>} : vector<8x64xf32>, vector<64x128xf32>, vector<8x128xf32> -> vector<8x128xf32>
    %388 = arith.addf %387, %11 : vector<8x128xf32>
    %389 = vector.extract_strided_slice %388 {offsets = [0, 0], sizes = [8, 32], strides = [1, 1]} : vector<8x128xf32> to vector<8x32xf32>
    %390 = arith.negf %389 : vector<8x32xf32>
    %391 = math.exp %390 : vector<8x32xf32>
    %cst_75 = arith.constant 1.000000e+00 : f32
    %392 = vector.broadcast %cst_75 : f32 to vector<8x32xf32>
    %393 = arith.addf %392, %391 : vector<8x32xf32>
    %394 = arith.divf %392, %393 : vector<8x32xf32>
    %395 = vector.extract_strided_slice %388 {offsets = [0, 32], sizes = [8, 32], strides = [1, 1]} : vector<8x128xf32> to vector<8x32xf32>
    %396 = arith.negf %395 : vector<8x32xf32>
    %397 = math.exp %396 : vector<8x32xf32>
    %cst_76 = arith.constant 1.000000e+00 : f32
    %398 = vector.broadcast %cst_76 : f32 to vector<8x32xf32>
    %399 = arith.addf %398, %397 : vector<8x32xf32>
    %400 = arith.divf %398, %399 : vector<8x32xf32>
    %401 = vector.extract_strided_slice %388 {offsets = [0, 64], sizes = [8, 32], strides = [1, 1]} : vector<8x128xf32> to vector<8x32xf32>
    %402 = math.tanh %401 : vector<8x32xf32>
    %403 = vector.extract_strided_slice %388 {offsets = [0, 96], sizes = [8, 32], strides = [1, 1]} : vector<8x128xf32> to vector<8x32xf32>
    %404 = arith.negf %403 : vector<8x32xf32>
    %405 = math.exp %404 : vector<8x32xf32>
    %cst_77 = arith.constant 1.000000e+00 : f32
    %406 = vector.broadcast %cst_77 : f32 to vector<8x32xf32>
    %407 = arith.addf %406, %405 : vector<8x32xf32>
    %408 = arith.divf %406, %407 : vector<8x32xf32>
    %409 = arith.mulf %400, %354 : vector<8x32xf32>
    %410 = arith.mulf %394, %402 : vector<8x32xf32>
    %411 = arith.addf %409, %410 : vector<8x32xf32>
    %412 = math.tanh %411 : vector<8x32xf32>
    %413 = arith.mulf %408, %412 : vector<8x32xf32>
    %c48 = arith.constant 48 : index
    %c0_78 = arith.constant 0 : index
    %414 = vector.load %arg12[%c48, %c0_78] : memref<64x32xf32, #tpu.memory_space<vmem>>, vector<8x32xf32>
    tpu.vector_store %arg12[%c48, %c0_78], %413 {strides = array<i32>} : memref<64x32xf32, #tpu.memory_space<vmem>>, vector<8x32xf32>,
    %415 = vector.extract_strided_slice %6 {offsets = [56, 0], sizes = [8, 128], strides = [1, 1]} : vector<64x128xf32> to vector<8x128xf32>
    %cst_79 = arith.constant dense<0.000000e+00> : vector<8x128xf32>
    %416 = tpu.matmul %385, %7, %cst_79 {dimension_numbers = #tpu.dot_dimension_numbers<[1], [0], [0], [1], [0, 0, 1, 1], [], []>} : vector<8x32xf32>, vector<32x128xf32>, vector<8x128xf32> -> vector<8x128xf32>
    %417 = arith.addf %415, %416 : vector<8x128xf32>
    %418 = vector.extract_strided_slice %417 {offsets = [0, 0], sizes = [8, 32], strides = [1, 1]} : vector<8x128xf32> to vector<8x32xf32>
    %419 = arith.negf %418 : vector<8x32xf32>
    %420 = math.exp %419 : vector<8x32xf32>
    %cst_80 = arith.constant 1.000000e+00 : f32
    %421 = vector.broadcast %cst_80 : f32 to vector<8x32xf32>
    %422 = arith.addf %421, %420 : vector<8x32xf32>
    %423 = arith.divf %421, %422 : vector<8x32xf32>
    %424 = vector.extract_strided_slice %417 {offsets = [0, 32], sizes = [8, 32], strides = [1, 1]} : vector<8x128xf32> to vector<8x32xf32>
    %425 = arith.negf %424 : vector<8x32xf32>
    %426 = math.exp %425 : vector<8x32xf32>
    %cst_81 = arith.constant 1.000000e+00 : f32
    %427 = vector.broadcast %cst_81 : f32 to vector<8x32xf32>
    %428 = arith.addf %427, %426 : vector<8x32xf32>
    %429 = arith.divf %427, %428 : vector<8x32xf32>
    %430 = vector.extract_strided_slice %417 {offsets = [0, 64], sizes = [8, 32], strides = [1, 1]} : vector<8x128xf32> to vector<8x32xf32>
    %431 = math.tanh %430 : vector<8x32xf32>
    %432 = vector.extract_strided_slice %417 {offsets = [0, 96], sizes = [8, 32], strides = [1, 1]} : vector<8x128xf32> to vector<8x32xf32>
    %433 = arith.negf %432 : vector<8x32xf32>
    %434 = math.exp %433 : vector<8x32xf32>
    %cst_82 = arith.constant 1.000000e+00 : f32
    %435 = vector.broadcast %cst_82 : f32 to vector<8x32xf32>
    %436 = arith.addf %435, %434 : vector<8x32xf32>
    %437 = arith.divf %435, %436 : vector<8x32xf32>
    %438 = arith.mulf %429, %383 : vector<8x32xf32>
    %439 = arith.mulf %423, %431 : vector<8x32xf32>
    %440 = arith.addf %438, %439 : vector<8x32xf32>
    %441 = math.tanh %440 : vector<8x32xf32>
    %442 = arith.mulf %437, %441 : vector<8x32xf32>
    %443 = tpu.concatenate %442, %413 in 1 : vector<8x32xf32>, vector<8x32xf32> -> vector<8x64xf32>
    %cst_83 = arith.constant dense<0.000000e+00> : vector<8x128xf32>
    %444 = tpu.matmul %443, %8, %cst_83 {dimension_numbers = #tpu.dot_dimension_numbers<[1], [0], [0], [1], [0, 0, 1, 1], [], []>} : vector<8x64xf32>, vector<64x128xf32>, vector<8x128xf32> -> vector<8x128xf32>
    %445 = arith.addf %444, %11 : vector<8x128xf32>
    %446 = vector.extract_strided_slice %445 {offsets = [0, 0], sizes = [8, 32], strides = [1, 1]} : vector<8x128xf32> to vector<8x32xf32>
    %447 = arith.negf %446 : vector<8x32xf32>
    %448 = math.exp %447 : vector<8x32xf32>
    %cst_84 = arith.constant 1.000000e+00 : f32
    %449 = vector.broadcast %cst_84 : f32 to vector<8x32xf32>
    %450 = arith.addf %449, %448 : vector<8x32xf32>
    %451 = arith.divf %449, %450 : vector<8x32xf32>
    %452 = vector.extract_strided_slice %445 {offsets = [0, 32], sizes = [8, 32], strides = [1, 1]} : vector<8x128xf32> to vector<8x32xf32>
    %453 = arith.negf %452 : vector<8x32xf32>
    %454 = math.exp %453 : vector<8x32xf32>
    %cst_85 = arith.constant 1.000000e+00 : f32
    %455 = vector.broadcast %cst_85 : f32 to vector<8x32xf32>
    %456 = arith.addf %455, %454 : vector<8x32xf32>
    %457 = arith.divf %455, %456 : vector<8x32xf32>
    %458 = vector.extract_strided_slice %445 {offsets = [0, 64], sizes = [8, 32], strides = [1, 1]} : vector<8x128xf32> to vector<8x32xf32>
    %459 = math.tanh %458 : vector<8x32xf32>
    %460 = vector.extract_strided_slice %445 {offsets = [0, 96], sizes = [8, 32], strides = [1, 1]} : vector<8x128xf32> to vector<8x32xf32>
    %461 = arith.negf %460 : vector<8x32xf32>
    %462 = math.exp %461 : vector<8x32xf32>
    %cst_86 = arith.constant 1.000000e+00 : f32
    %463 = vector.broadcast %cst_86 : f32 to vector<8x32xf32>
    %464 = arith.addf %463, %462 : vector<8x32xf32>
    %465 = arith.divf %463, %464 : vector<8x32xf32>
    %466 = arith.mulf %457, %411 : vector<8x32xf32>
    %467 = arith.mulf %451, %459 : vector<8x32xf32>
    %468 = arith.addf %466, %467 : vector<8x32xf32>
    %469 = math.tanh %468 : vector<8x32xf32>
    %470 = arith.mulf %465, %469 : vector<8x32xf32>
    %c56 = arith.constant 56 : index
    %c0_87 = arith.constant 0 : index
    %471 = vector.load %arg12[%c56, %c0_87] : memref<64x32xf32, #tpu.memory_space<vmem>>, vector<8x32xf32>
    tpu.vector_store %arg12[%c56, %c0_87], %470 {strides = array<i32>} : memref<64x32xf32, #tpu.memory_space<vmem>>, vector<8x32xf32>,
    %c0_88 = arith.constant 0 : index
    %c0_89 = arith.constant 0 : index
    %472 = vector.load %arg12[%c0_88, %c0_89] : memref<64x32xf32, #tpu.memory_space<vmem>>, vector<64x32xf32>
    %c0_90 = arith.constant 0 : index
    %c0_91 = arith.constant 0 : index
    %473 = vector.load %arg7[%c0_90, %c0_91] : memref<32x128xf32, #tpu.memory_space<vmem>>, vector<32x128xf32>
    %cst_92 = arith.constant dense<0.000000e+00> : vector<64x128xf32>
    %474 = tpu.matmul %472, %473, %cst_92 {dimension_numbers = #tpu.dot_dimension_numbers<[1], [0], [0], [1], [0, 0, 1, 1], [], []>} : vector<64x32xf32>, vector<32x128xf32>, vector<64x128xf32> -> vector<64x128xf32>
    %c0_93 = arith.constant 0 : index
    %c0_94 = arith.constant 0 : index
    %475 = vector.load %arg8[%c0_93, %c0_94] : memref<1x128xf32, #tpu.memory_space<vmem>>, vector<1x128xf32>
    %476 = vector.shape_cast %475 : vector<1x128xf32> to vector<1x128xf32>
    %477 = vector.broadcast %476 : vector<1x128xf32> to vector<64x128xf32>
    %478 = arith.addf %474, %477 : vector<64x128xf32>
    %cst_95 = arith.constant 0.000000e+00 : f32
    %479 = vector.broadcast %cst_95 : f32 to vector<64x128xf32>
    %480 = arith.maximumf %478, %479 : vector<64x128xf32>
    %c0_96 = arith.constant 0 : index
    %c0_97 = arith.constant 0 : index
    %481 = vector.load %arg9[%c0_96, %c0_97] : memref<128x128xf32, #tpu.memory_space<vmem>>, vector<128x128xf32>
    %cst_98 = arith.constant dense<0.000000e+00> : vector<64x128xf32>
    %482 = tpu.matmul %480, %481, %cst_98 {dimension_numbers = #tpu.dot_dimension_numbers<[1], [0], [0], [1], [0, 0, 1, 1], [], []>} : vector<64x128xf32>, vector<128x128xf32>, vector<64x128xf32> -> vector<64x128xf32>
    %c0_99 = arith.constant 0 : index
    %c0_100 = arith.constant 0 : index
    %483 = vector.load %arg10[%c0_99, %c0_100] : memref<1x128xf32, #tpu.memory_space<vmem>>, vector<1x128xf32>
    %484 = vector.shape_cast %483 : vector<1x128xf32> to vector<1x128xf32>
    %485 = vector.broadcast %484 : vector<1x128xf32> to vector<64x128xf32>
    %486 = arith.addf %482, %485 : vector<64x128xf32>
    %cst_101 = arith.constant 0.000000e+00 : f32
    %487 = vector.broadcast %cst_101 : f32 to vector<64x128xf32>
    %488 = arith.maximumf %486, %487 : vector<64x128xf32>
    %c0_102 = arith.constant 0 : index
    %c0_103 = arith.constant 0 : index
    %489 = vector.load %arg11[%c0_102, %c0_103] : memref<64x128xf32, #tpu.memory_space<vmem>>, vector<64x128xf32>
    tpu.vector_store %arg11[%c0_102, %c0_103], %488 {strides = array<i32>} : memref<64x128xf32, #tpu.memory_space<vmem>>, vector<64x128xf32>,
    return
  }
  func.func @transform_0(%arg0: i32) -> (i32, i32) {
    %c0_i32 = arith.constant 0 : i32
    %c0_i32_0 = arith.constant 0 : i32
    %c0_i32_1 = arith.constant 0 : i32
    return %c0_i32, %c0_i32_0 : i32, i32
  }
  func.func @transform_1(%arg0: i32) -> (i32, i32) {
    %c0_i32 = arith.constant 0 : i32
    %c0_i32_0 = arith.constant 0 : i32
    %c0_i32_1 = arith.constant 0 : i32
    return %c0_i32, %c0_i32_0 : i32, i32
  }
  func.func @transform_2(%arg0: i32) -> (i32, i32) {
    %c0_i32 = arith.constant 0 : i32
    %c0_i32_0 = arith.constant 0 : i32
    %c0_i32_1 = arith.constant 0 : i32
    return %c0_i32, %c0_i32_0 : i32, i32
  }
  func.func @transform_3(%arg0: i32) -> (i32, i32) {
    %c0_i32 = arith.constant 0 : i32
    %c0_i32_0 = arith.constant 0 : i32
    %c0_i32_1 = arith.constant 0 : i32
    return %c0_i32, %c0_i32_0 : i32, i32
  }
  func.func @transform_4(%arg0: i32) -> (i32, i32) {
    %c0_i32 = arith.constant 0 : i32
    %c0_i32_0 = arith.constant 0 : i32
    %c0_i32_1 = arith.constant 0 : i32
    return %c0_i32, %c0_i32_0 : i32, i32
  }
  func.func @transform_5(%arg0: i32) -> (i32, i32) {
    %c0_i32 = arith.constant 0 : i32
    %c0_i32_0 = arith.constant 0 : i32
    %c0_i32_1 = arith.constant 0 : i32
    return %c0_i32, %c0_i32_0 : i32, i32
  }
  func.func @transform_6(%arg0: i32) -> (i32, i32) {
    %c0_i32 = arith.constant 0 : i32
    %c0_i32_0 = arith.constant 0 : i32
    %c0_i32_1 = arith.constant 0 : i32
    return %c0_i32, %c0_i32_0 : i32, i32
  }
  func.func @transform_7(%arg0: i32) -> (i32, i32) {
    %c0_i32 = arith.constant 0 : i32
    %c0_i32_0 = arith.constant 0 : i32
    %c0_i32_1 = arith.constant 0 : i32
    return %c0_i32, %c0_i32_0 : i32, i32
  }
  func.func @transform_8(%arg0: i32) -> (i32, i32) {
    %c0_i32 = arith.constant 0 : i32
    %c0_i32_0 = arith.constant 0 : i32
    %c0_i32_1 = arith.constant 0 : i32
    return %c0_i32, %c0_i32_0 : i32, i32
  }
  func.func @transform_9(%arg0: i32) -> (i32, i32) {
    %c0_i32 = arith.constant 0 : i32
    %c0_i32_0 = arith.constant 0 : i32
    %c0_i32_1 = arith.constant 0 : i32
    return %c0_i32, %c0_i32_0 : i32, i32
  }
  func.func @transform_10(%arg0: i32) -> (i32, i32) {
    %c0_i32 = arith.constant 0 : i32
    %c0_i32_0 = arith.constant 0 : i32
    %c0_i32_1 = arith.constant 0 : i32
    return %c0_i32, %c0_i32_0 : i32, i32
  }
}

</mosaic_0001>

<bundles_post_ra>
// kernel: admissions_lstm_forward.1
= control target key start
LH: loop header
LB: loop body
LE: loop exit
PB: predicated region body
PF: predicated region fallthrough
CT: control target
= control target key end

     0   :  { %15 = vsyncpa [#allocation4], 0  ;;  %s3714_s0 = inlined_call_operand.vmem [shape: f32[64,1], index: 0, kind: input, shape index: {}]   ;;  %s3715_s1 = inlined_call_operand.vmem [shape: f32[1,128], index: 1, kind: input, shape index: {}]   ;;  %s3716_s2 = inlined_call_operand.hbm [shape: f32[32,128], index: 2, kind: input, shape index: {}]   ;;  %s3717_s3 = inlined_call_operand.vmem [shape: f32[1,128], index: 3, kind: input, shape index: {}]   ;;  %s3718_s4 = inlined_call_operand.hbm [shape: f32[64,128], index: 4, kind: input, shape index: {}]   ;;  %s3719_s5 = inlined_call_operand.vmem [shape: f32[1,128], index: 5, kind: input, shape index: {}]   ;;  %s3720_s6 = inlined_call_operand.hbm [shape: f32[32,128], index: 6, kind: input, shape index: {}]   ;;  %s3721_s7 = inlined_call_operand.vmem [shape: f32[1,128], index: 7, kind: input, shape index: {}]   ;;  %s3722_s8 = inlined_call_operand.vmem [shape: f32[128,128], index: 8, kind: input, shape index: {}]   ;;  %s3723_s9 = inlined_call_operand.vmem [shape: f32[1,128], index: 9, kind: input, shape index: {}]   ;;  %s3724_s10 = inlined_call_operand.vmem [shape: f32[64,128], index: 10, kind: output, shape index: {}]  }
   0x1   :  { %16 = vsyncpa [#allocation6], 0  ;;  %s3126_s13 = smov [#allocation5]   ;;  %s3127_s15 = smov [#allocation3]  }
   0x2   :  { %s40_s14 = sshll.u32 %s3126_s13, 4  ;;  %s26_s16 = sshll.u32 %s3127_s15, 4  ;;  %s41_s14 = int_to_ptr.vmem [resolvable:$true] %s40_s14  ;;  %s3191_s16 = int_to_ptr.vmem [resolvable:$true] %s26_s16 }
   0x3   :  { %s3056_s19 = scalar_lea.hbm %s3718_s4, 1024 }
   0x4   :  { %p3057_p0 = scmp.ne.s32.totalorder %s3718_s4, %s3056_s19  ;;  %p3060_p1 = scmp.lt.u32.totalorder %s3056_s19, %s3718_s4 }
   0x6   :  { %p3062_p2 = pnand %p3060_p1, %p3057_p0 }
   0x8   :  { %3065 = shalt.err (!%p3062_p2)
}
   0x9   :  { %s3066_s24 = scalar_lea.vmem %s41_s14, 1024  ;;  %p3071_p4 = scmp.lt.s32.totalorder %s41_s14, %s41_s14 }
   0xa   :  { %p3067_p3 = scmp.ne.s32.totalorder %s41_s14, %s3066_s24  ;;  %p3072_p5 = scmp.lt.s32.totalorder %s3066_s24, %s3066_s24 }
   0xc   :  { %p3073_p6 = por %p3072_p5, %p3071_p4 }
   0xe   :  { %p3074_p7 = pnand %p3073_p6, %p3067_p3 }
  0x10   :  { %3077 = shalt.err (!%p3074_p7)
}
  0x11   :  { %s3128_s25 = smov 128   ;;  %s3129_s26 = smov 8  }
  0x12   :  { %46 = dma.hbm_to_vmem [thread:$0]  %s3718_s4, 1024, %s41_s14, [#allocation6], %s3128_s25, %s3128_s25, %s3129_s26  }
  0x13   :  { %s3078_s11 = scalar_lea.hbm %s3716_s2, 512 }
  0x14   :  { %p3079_p8 = scmp.ne.s32.totalorder %s3716_s2, %s3078_s11  ;;  %p3082_p9 = scmp.lt.u32.totalorder %s3078_s11, %s3716_s2 }
  0x16   :  { %p3084_p10 = pnand %p3082_p9, %p3079_p8 }
  0x18   :  { %3087 = shalt.err (!%p3084_p10)
}
  0x19   :  { %s3088_s18 = scalar_lea.vmem %s3191_s16, 512  ;;  %p3093_p12 = scmp.lt.s32.totalorder %s3191_s16, %s3191_s16 }
  0x1a   :  { %p3089_p11 = scmp.ne.s32.totalorder %s3191_s16, %s3088_s18  ;;  %p3094_p13 = scmp.lt.s32.totalorder %s3088_s18, %s3088_s18 }
  0x1c   :  { %p3095_p0 = por %p3094_p13, %p3093_p12 }
  0x1e   :  { %p3096_p1 = pnand %p3095_p0, %p3089_p11 }
  0x20   :  { %3099 = shalt.err (!%p3096_p1)
}
  0x21   :  { %32 = dma.hbm_to_vmem [thread:$0]  %s3716_s2, 512, %s3191_s16, [#allocation4], %s3128_s25, %s3128_s25, %s3129_s26  }
  0x22   :  { %s3130_s19 = smov [#allocation7]   ;;  %s3100_s23 = scalar_lea.hbm %s3720_s6, 512 }
  0x23   :  { %s54_s20 = sshll.u32 %s3130_s19, 4  ;;  %p3101_p2 = scmp.ne.s32.totalorder %s3720_s6, %s3100_s23  ;;  %s55_s20 = int_to_ptr.vmem [resolvable:$true] %s54_s20 }
  0x24   :  { %p3104_p3 = scmp.lt.u32.totalorder %s3100_s23, %s3720_s6 }
  0x26   :  { %p3106_p4 = pnand %p3104_p3, %p3101_p2 }
  0x28   :  { %3109 = shalt.err (!%p3106_p4)
}
  0x29   :  { %s3110_s30 = scalar_lea.vmem %s55_s20, 512  ;;  %p3115_p6 = scmp.lt.s32.totalorder %s55_s20, %s55_s20 }
  0x2a   :  { %p3111_p5 = scmp.ne.s32.totalorder %s55_s20, %s3110_s30  ;;  %p3116_p7 = scmp.lt.s32.totalorder %s3110_s30, %s3110_s30 }
  0x2c   :  { %p3117_p8 = por %p3116_p7, %p3115_p6 }
  0x2e   :  { %p3118_p9 = pnand %p3117_p8, %p3111_p5 }
  0x30   :  { %3121 = shalt.err (!%p3118_p9)
}
  0x31   :  { %60 = dma.hbm_to_vmem [thread:$0]  %s3720_s6, 512, %s55_s20, [#allocation6], %s3128_s25, %s3128_s25, %s3129_s26  }
  0x32   :  { %3122 = dma.done.wait [#allocation4], 512  }
  0x33   :  { %3123 = vsyncadd [#allocation4], 4294966784 }
  0x34   :  { %3124 = dma.done.wait [#allocation6], 1536  }
  0x35   :  { %3125 = vsyncadd [#allocation6], 4294965760  ;;  %v3131_v0 = vmov 0.0|0.0   ;;  %vm3132_vm0 = vmmov 0   ;;  %v3133_v1 = vmov 0.0   ;;  %vm117_vm1 = vcmask 1040384  }
  0x36   :  { %2734 = vmatprep.subr.bf16.mxu1 %v3131_v0  ;;  %2438 = vmatprep.mubr.msk.f32.mxu1 %vm3132_vm0, %v3133_v1  ;;  %vm92_vm2 = vcmask 7168   ;;  %v226_v2 = vld [vmem:[#allocation3] sm:$0xff]  ;;  %v227_v3 = vld [vmem:[#allocation3 + $0x8] sm:$0xff]  ;;  %v228_v8 = vld [vmem:[#allocation3 + $0x10] sm:$0xff]  ;;  %s3134_s17 = smov 64   ;;  %vm245_vm3 = vcmask 261120  }
  0x37   :  { %v84_v4 = vld [vmem:[%s3715_s1] sm:$0x1]  ;;  %v3249_v5 = vpack.c.bf16 %v227_v3, %v226_v2  ;;  %v77_v7 = vld [vmem:[%s3714_s0 + $0x8] sm:$0xff]  ;;  %v229_v9 = vld [vmem:[#allocation3 + $0x18] sm:$0xff]  ;;  %vm349_vm4 = vcmask 523264  }
  0x38   :  { %2416 = vmatprep.subr.msk.mxu0 %vm117_vm1, %v84_v4  ;;  %v76_v6 = vld [vmem:[%s3714_s0] sm:$0xff]  ;;  %v3260_v10 = vpack.c.bf16 %v229_v9, %v228_v8  ;;  %v231_v29 = vld [vmem:[#allocation5 + $0x8] sm:$0xff]  ;;  %v78_v30 = vld [vmem:[%s3714_s0 + $0x10] sm:$0xff] }
  0x39   :  { %2417 = vmatpush3.msk.msra.mxu0 %vm117_vm1, %v84_v4  ;;  %2418 = vmatprep.mubr.msk.f32.mxu0 %vm92_vm2, %v76_v6  ;;  %v3278_v12 = vld [vmem:[%s3717_s3] ss:$0 sm:$0xff]  ;;  %s3135_s3 = smov 32   ;;  %v79_v32 = vld [vmem:[%s3714_s0 + $0x18] sm:$0xff]  ;;  %v232_v33 = vld [vmem:[#allocation5 + $0x10] sm:$0xff] }
  0x3a   :  { %2736 = vmatpush3.bf16.msra.mxu1 %v3249_v5  ;;  %2419 = vmatmul.mubr.msk.f32.vlgmr.msra.gmra.mrb[0].mxu0 %vm92_vm2, %v77_v7  ;;  %v230_v28 = vld [vmem:[#allocation5] sm:$0xff]  ;;  %v233_v34 = vld [vmem:[#allocation5 + $0x18] sm:$0xff]  ;;  %v81_v37 = vld [vmem:[%s3714_s0 + $0x28] sm:$0xff] }
  0x3b   :  { %2737 = vmatprep.subr.bf16.mxu1 %v3131_v0  ;;  %2740 = vmatprep.subr.bf16.mxu0 %v3131_v0  ;;  %v3289_v31 = vpack.c.bf16 %v231_v29, %v230_v28  ;;  %v80_v35 = vld [vmem:[%s3714_s0 + $0x20] sm:$0xff]  ;;  %v3300_v36 = vpack.c.bf16 %v233_v34, %v232_v33  ;;  %v235_v39 = vld [vmem:[#allocation5 + $0x28] sm:$0xff]  ;;  %v82_v40 = vld [vmem:[%s3714_s0 + $0x30] sm:$0xff] }
  0x3c   :  { %2421 = vmatprep.mubr.msk.f32.mxu0 %vm92_vm2, %v78_v30  ;;  %v234_v38 = vld [vmem:[#allocation5 + $0x20] sm:$0xff]  ;;  %v83_v42 = vld [vmem:[%s3714_s0 + $0x38] sm:$0xff]  ;;  %v236_v43 = vld [vmem:[#allocation5 + $0x30] sm:$0xff] }
  0x3d   :  { %2742 = vmatpush3.bf16.msra.mxu0 %v3289_v31  ;;  %v3312_v41 = vpack.c.bf16 %v235_v39, %v234_v38  ;;  %v237_v44 = vld [vmem:[#allocation5 + $0x38] sm:$0xff]  ;;  %v3366_v58 = vld [vmem:[%s3719_s5] ss:$0 sm:$0xff] }
  0x3e   :  { %2739 = vmatpush3.bf16.msra.mxu1 %v3260_v10  ;;  %2422 = vmatmul.mubr.msk.f32.gmra.mrb[2].mxu0 %vm92_vm2, %v79_v32  ;;  %v3322_v46 = vpack.c.bf16 %v237_v44, %v236_v43 }
  0x3f   :  { %2752 = vmatprep.subr.bf16.mxu1 %v3131_v0  ;;  %2424 = vmatprep.mubr.msk.f32.mxu0 %vm92_vm2, %v80_v35 }
  0x40   :  { %2743 = vmatprep.subr.bf16.mxu0 %v3131_v0 }
  0x41   :  { %2439 = vmatmul.mubr.f32.vlgmr.msra.gmra.mrb[0].mxu1 %v3133_v1  ;;  %2745 = vmatpush3.bf16.msra.mxu0 %v3300_v36 }
  0x42   :  { %2754 = vmatpush3.bf16.msra.mxu1 %v3249_v5  ;;  %2468 = vmatprep.mubr.msk.f32.mxu1 %vm3132_vm0, %v3133_v1 }
  0x43   :  { %2755 = vmatprep.subr.bf16.mxu1 %v3131_v0  ;;  %2425 = vmatmul.mubr.msk.f32.gmra.mrb[4].mxu0 %vm92_vm2, %v81_v37 }
  0x44   :  { %2427 = vmatprep.mubr.msk.f32.mxu0 %vm92_vm2, %v82_v40  ;;  %2746 = vmatprep.subr.bf16.mxu0 %v3131_v0 }
  0x45   :  { %2748 = vmatpush3.bf16.msra.mxu0 %v3312_v41 }
  0x46   :  { %2757 = vmatpush3.bf16.msra.mxu1 %v3260_v10  ;;  %2749 = vmatprep.subr.bf16.mxu0 %v3131_v0 }
  0x47   :  { %2758 = vmatprep.subr.bf16.mxu1 %v3131_v0  ;;  %2428 = vmatmul.mubr.msk.f32.gmra.mrb[6].mxu0 %vm92_vm2, %v83_v42 }
  0x48   :  { %2457 = vmatprep.mubr.msk.f32.mxu0 %vm3132_vm0, %v3133_v1 }
  0x49   :  { %2751 = vmatpush3.bf16.msra.mxu0 %v3322_v46 }
  0x4a   :  { %2770 = vmatprep.subr.bf16.mxu0 %v3131_v0 }
 0x10d   :  { %v3273_v11 = vpop.f32.mrb[0].mxu0 }
 0x10e   :  { %v187_v13 = vpop.f32.mrb[1].mxu0  ;;  %v193_v57 = vadd.f32 %v3273_v11, %v3278_v12 }
 0x10f   :  { %v188_v14 = vadd.f32 %v3278_v12, %v187_v13 }
 0x111   :  { %v3330_v49 = vpop.f32.mrb[2].mxu0 }
 0x112   :  { %v3332_v50 = vpop.f32.mrb[3].mxu0 }
 0x113   :  { %v198_v37 = vadd.f32 %v3278_v12, %v3332_v50 }
 0x114   :  { %v315_v15 = vpop.f32.mrb[0].mxu1 }
 0x115   :  { %v319_v16 = vadd.f32 %v315_v15, %v188_v14  ;;  %v2440_v17 = vpop.f32.mrb[1].mxu1 }
 0x116   :  { %v3334_v51 = vpop.f32.mrb[4].mxu0 }
 0x117   :  { %2928 = vtanh.f32 %v319_v16  ;;  %v2218_v19 = vmul.f32 -1.442695, %v319_v16  ;;  %v3336_v52 = vpop.f32.mrb[5].mxu0 }
 0x119   :  { %2930 = vpow2.f32 %v2218_v19 }
 0x11a   :  { %v3338_v53 = vpop.f32.mrb[6].mxu0 }
 0x11b   :  { %v3340_v54 = vpop.f32.mrb[7].mxu0 }
 0x121   :  { %v2929_v18 = vpop.eup %2928 }
 0x122   :  { %329 = vrot.lane.b32.xlu0 %v2929_v18, %s3134_s17 }
 0x123   :  { %v2931_v20 = vpop.eup %2930 }
 0x124   :  { %v323_v21 = vadd.f32 1.0, %v2931_v20 }
 0x126   :  { %2932 = vrcp.f32 %v323_v21 }
 0x130   :  { %v2933_v22 = vpop.eup %2932 }
 0x131   :  { %v327_v25 = vmul.f32 0.0, %v2933_v22 }
 0x194   :  { %v330_v23 = vpop.permute.xlu0 %329 }
 0x195   :  { %v332_v24 = vmul.f32 %v2933_v22, %v330_v23 }
 0x197   :  { %334 = vrot.lane.b32.xlu0 %v332_v24, %s3135_s3 }
 0x209   :  { %v335_v26 = vpop.permute.xlu0 %334 }
 0x20a   :  { %v3283_v27 = vadd.f32 %v335_v26, %v327_v25 }
 0x20c   :  { %2934 = vtanh.f32 %v3283_v27 }
 0x216   :  { %v2935_v45 = vpop.eup %2934 }
 0x217   :  { %340 = vrot.lane.b32.xlu1 %v2935_v45, %s3134_s17 }
 0x289   :  { %v341_v47 = vpop.permute.xlu1 %340 }
 0x28a   :  { %v343_v48 = vmul.f32 %v2933_v22, %v341_v47 }
 0x28c   :  { %345 = vrot.lane.b32.xlu1 %v343_v48, %s3135_s3 }
 0x2fe   :  { %v346_v55 = vpop.permute.xlu1 %345 }
 0x2ff   :  { %v348_v56 = vsel %vm245_vm3, %v346_v55, 0.0  ;;  %2469 = vmatmul.mubr.msk.f32.vlgmr.msra.gmra.mrb[2].mxu1 %vm245_vm3, %v346_v55 }
 0x300   :  { %2458 = vmatmul.mubr.msk.f32.vlgmr.msra.gmra.mrb[8].mxu0 %vm349_vm4, %v348_v56  ;;  %2760 = vmatpush3.bf16.msra.mxu1 %v3289_v31 }
 0x301   :  { %2761 = vmatprep.subr.bf16.mxu1 %v3131_v0  ;;  %2772 = vmatpush3.bf16.msra.mxu0 %v3249_v5 }
 0x302   :  { %2773 = vmatprep.subr.bf16.mxu0 %v3131_v0  ;;  %2498 = vmatprep.mubr.msk.f32.mxu0 %vm3132_vm0, %v3133_v1 }
 0x303   :  { %2487 = vmatprep.mubr.msk.f32.mxu1 %vm3132_vm0, %v3133_v1 }
 0x304   :  { %2763 = vmatpush3.bf16.msra.mxu1 %v3300_v36 }
 0x305   :  { %2764 = vmatprep.subr.bf16.mxu1 %v3131_v0  ;;  %2775 = vmatpush3.bf16.msra.mxu0 %v3260_v10 }
 0x306   :  { %2806 = vmatprep.subr.bf16.mxu0 %v3131_v0 }
 0x308   :  { %2766 = vmatpush3.bf16.msra.mxu1 %v3312_v41 }
 0x309   :  { %2767 = vmatprep.subr.bf16.mxu1 %v3131_v0 }
 0x30c   :  { %2769 = vmatpush3.bf16.msra.mxu1 %v3322_v46 }
 0x30d   :  { %2776 = vmatprep.subr.bf16.mxu1 %v3131_v0 }
 0x3d2   :  { %v520_v59 = vpop.f32.mrb[2].mxu1 }
 0x3d3   :  { %v524_v60 = vadd.f32 %v520_v59, %v193_v57  ;;  %v419_v61 = vpop.f32.mrb[8].mxu0  ;;  %v2470_v62 = vpop.f32.mrb[3].mxu1 }
 0x3d4   :  { %v420_v63 = vadd.f32 %v3366_v58, %v419_v61  ;;  %v2459_v2 = vpop.f32.mrb[9].mxu0 }
 0x3d5   :  { %2936 = vtanh.f32 %v524_v60  ;;  %v2222_v6 = vmul.f32 -1.442695, %v524_v60 }
 0x3d6   :  { %2938 = vtanh.f32 %v420_v63  ;;  %v2220_v7 = vmul.f32 -1.442695, %v420_v63 }
 0x3d7   :  { %2940 = vpow2.f32 %v2222_v6 }
 0x3d8   :  { %2942 = vpow2.f32 %v2220_v7 }
 0x3df   :  { %v2937_v3 = vpop.eup %2936 }
 0x3e0   :  { %v2939_v4 = vpop.eup %2938  ;;  %534 = vrot.lane.b32.xlu1 %v2937_v3, %s3134_s17 }
 0x3e1   :  { %432 = vrot.lane.b32.xlu0 %v2939_v4, %s3134_s17  ;;  %v2941_v8 = vpop.eup %2940 }
 0x3e2   :  { %v2943_v9 = vpop.eup %2942  ;;  %v528_v11 = vadd.f32 1.0, %v2941_v8 }
 0x3e3   :  { %v426_v13 = vadd.f32 1.0, %v2943_v9 }
 0x3e4   :  { %2944 = vrcp.f32 %v528_v11 }
 0x3e5   :  { %2946 = vrcp.f32 %v426_v13 }
 0x3ee   :  { %v2945_v14 = vpop.eup %2944 }
 0x3ef   :  { %v2947_v16 = vpop.eup %2946  ;;  %v532_v20 = vmul.f32 %v2945_v14, %v3283_v27 }
 0x3f0   :  { %v430_v22 = vmul.f32 0.0, %v2947_v16 }
 0x452   :  { %v535_v15 = vpop.permute.xlu1 %534 }
 0x453   :  { %v537_v17 = vmul.f32 %v2945_v14, %v535_v15  ;;  %v433_v18 = vpop.permute.xlu0 %432 }
 0x454   :  { %v435_v19 = vmul.f32 %v2947_v16, %v433_v18 }
 0x455   :  { %539 = vrot.lane.b32.xlu1 %v537_v17, %s3135_s3 }
 0x456   :  { %437 = vrot.lane.b32.xlu0 %v435_v19, %s3135_s3 }
 0x4c7   :  { %v540_v21 = vpop.permute.xlu1 %539 }
 0x4c8   :  { %v3374_v23 = vadd.f32 %v540_v21, %v532_v20  ;;  %v438_v24 = vpop.permute.xlu0 %437 }
 0x4c9   :  { %v3376_v25 = vadd.f32 %v438_v24, %v430_v22 }
 0x4ca   :  { %2948 = vtanh.f32 %v3374_v23 }
 0x4cb   :  { %2950 = vtanh.f32 %v3376_v25 }
 0x4d4   :  { %v2949_v26 = vpop.eup %2948 }
 0x4d5   :  { %v2951_v28 = vpop.eup %2950  ;;  %545 = vrot.lane.b32.xlu1 %v2949_v26, %s3134_s17 }
 0x4d6   :  { %443 = vrot.lane.b32.xlu0 %v2951_v28, %s3134_s17 }
 0x547   :  { %v546_v29 = vpop.permute.xlu1 %545 }
 0x548   :  { %v548_v30 = vmul.f32 %v2945_v14, %v546_v29  ;;  %v444_v27 = vpop.permute.xlu0 %443 }
 0x549   :  { %v3382_v32 = vmul.f32 %v2947_v16, %v444_v27 }
 0x54a   :  { %550 = vrot.lane.b32.xlu0 %v548_v30, %s3135_s3 }
 0x54b   :  { %553 = vrot.lane.b32.xlu1 %v3382_v32, %s3134_s17 }
 0x5bc   :  { %v551_v33 = vpop.permute.xlu0 %550 }
 0x5bd   :  { %v554_v34 = vpop.permute.xlu1 %553  ;;  %2499 = vmatmul.mubr.msk.f32.vlgmr.msra.gmra.mrb[10].mxu0 %vm245_vm3, %v551_v33 }
 0x5be   :  { %v556_v35 = vsel %vm245_vm3, %v551_v33, %v554_v34  ;;  %2808 = vmatpush3.bf16.msra.mxu0 %v3249_v5  ;;  %2558 = vmatprep.mubr.msk.f32.mxu0 %vm3132_vm0, %v3133_v1 }
 0x5bf   :  { %2488 = vmatmul.mubr.msk.f32.vlgmr.msra.gmra.mrb[4].mxu1 %vm349_vm4, %v556_v35  ;;  %2809 = vmatprep.subr.bf16.mxu0 %v3131_v0 }
 0x5c0   :  { %2778 = vmatpush3.bf16.msra.mxu1 %v3289_v31  ;;  %2517 = vmatprep.mubr.msk.f32.mxu1 %vm3132_vm0, %v3133_v1 }
 0x5c1   :  { %2779 = vmatprep.subr.bf16.mxu1 %v3131_v0 }
 0x5c2   :  { %2811 = vmatpush3.bf16.msra.mxu0 %v3260_v10 }
 0x5c3   :  { %2812 = vmatprep.subr.bf16.mxu0 %v3131_v0 }
 0x5c4   :  { %2781 = vmatpush3.bf16.msra.mxu1 %v3300_v36 }
 0x5c5   :  { %2782 = vmatprep.subr.bf16.mxu1 %v3131_v0 }
 0x5c8   :  { %2784 = vmatpush3.bf16.msra.mxu1 %v3312_v41 }
 0x5c9   :  { %2785 = vmatprep.subr.bf16.mxu1 %v3131_v0 }
 0x5cc   :  { %2787 = vmatpush3.bf16.msra.mxu1 %v3322_v46 }
 0x5cd   :  { %2788 = vmatprep.subr.bf16.mxu1 %v3131_v0 }
 0x690   :  { %v727_v38 = vpop.f32.mrb[10].mxu0 }
 0x691   :  { %v731_v39 = vadd.f32 %v727_v38, %v198_v37  ;;  %v2500_v40 = vpop.f32.mrb[11].mxu0 }
 0x692   :  { %v626_v42 = vpop.f32.mrb[4].mxu1 }
 0x693   :  { %2952 = vtanh.f32 %v731_v39  ;;  %v627_v43 = vadd.f32 %v3366_v58, %v626_v42  ;;  %v2489_v44 = vpop.f32.mrb[5].mxu1  ;;  %v2226_v48 = vmul.f32 -1.442695, %v731_v39 }
 0x695   :  { %2954 = vtanh.f32 %v627_v43  ;;  %v2224_v55 = vmul.f32 -1.442695, %v627_v43 }
 0x696   :  { %2956 = vpow2.f32 %v2226_v48 }
 0x697   :  { %2958 = vpow2.f32 %v2224_v55 }
 0x69d   :  { %v2953_v45 = vpop.eup %2952 }
 0x69e   :  { %741 = vrot.lane.b32.xlu1 %v2953_v45, %s3134_s17 }
 0x69f   :  { %v2955_v47 = vpop.eup %2954 }
 0x6a0   :  { %639 = vrot.lane.b32.xlu0 %v2955_v47, %s3134_s17  ;;  %v2957_v50 = vpop.eup %2956 }
 0x6a1   :  { %v2959_v56 = vpop.eup %2958  ;;  %v735_v57 = vadd.f32 1.0, %v2957_v50 }
 0x6a2   :  { %v633_v59 = vadd.f32 1.0, %v2959_v56 }
 0x6a3   :  { %2960 = vrcp.f32 %v735_v57 }
 0x6a4   :  { %2962 = vrcp.f32 %v633_v59 }
 0x6ad   :  { %v2961_v60 = vpop.eup %2960 }
 0x6ae   :  { %v2963_v63 = vpop.eup %2962  ;;  %v739_v4 = vmul.f32 %v2961_v60, %v3374_v23 }
 0x6af   :  { %v637_v8 = vmul.f32 %v2963_v63, %v3376_v25  ;;  %v203_v25 = vadd.f32 %v3330_v49, %v3278_v12 }
 0x710   :  { %v742_v61 = vpop.permute.xlu1 %741 }
 0x711   :  { %v744_v62 = vmul.f32 %v2961_v60, %v742_v61 }
 0x712   :  { %v640_v2 = vpop.permute.xlu0 %639 }
 0x713   :  { %746 = vrot.lane.b32.xlu1 %v744_v62, %s3135_s3  ;;  %v642_v3 = vmul.f32 %v2963_v63, %v640_v2 }
 0x715   :  { %644 = vrot.lane.b32.xlu0 %v642_v3, %s3135_s3 }
 0x785   :  { %v747_v6 = vpop.permute.xlu1 %746 }
 0x786   :  { %v3414_v7 = vadd.f32 %v747_v6, %v739_v4 }
 0x787   :  { %v645_v9 = vpop.permute.xlu0 %644 }
 0x788   :  { %2964 = vtanh.f32 %v3414_v7  ;;  %v647_v11 = vadd.f32 %v645_v9, %v637_v8 }
 0x78a   :  { %2966 = vtanh.f32 %v647_v11 }
 0x792   :  { %v2965_v13 = vpop.eup %2964 }
 0x793   :  { %752 = vrot.lane.b32.xlu1 %v2965_v13, %s3134_s17 }
 0x794   :  { %v2967_v14 = vpop.eup %2966 }
 0x795   :  { %650 = vrot.lane.b32.xlu0 %v2967_v14, %s3134_s17 }
 0x805   :  { %v753_v15 = vpop.permute.xlu1 %752 }
 0x806   :  { %v755_v16 = vmul.f32 %v2961_v60, %v753_v15 }
 0x807   :  { %v651_v17 = vpop.permute.xlu0 %650 }
 0x808   :  { %757 = vrot.lane.b32.xlu0 %v755_v16, %s3135_s3  ;;  %v3421_v18 = vmul.f32 %v2963_v63, %v651_v17 }
 0x80a   :  { %760 = vrot.lane.b32.xlu1 %v3421_v18, %s3134_s17 }
 0x87a   :  { %v758_v19 = vpop.permute.xlu0 %757 }
 0x87c   :  { %v761_v20 = vpop.permute.xlu1 %760 }
 0x87d   :  { %v763_v21 = vsel %vm245_vm3, %v758_v19, %v761_v20 }
 0x87e   :  { %2518 = vmatmul.mubr.msk.f32.vlgmr.msra.gmra.mrb[6].mxu1 %vm349_vm4, %v763_v21 }
 0x87f   :  { %2790 = vmatpush3.bf16.msra.mxu1 %v3249_v5  ;;  %2528 = vmatprep.mubr.msk.f32.mxu1 %vm3132_vm0, %v3133_v1 }
 0x880   :  { %2791 = vmatprep.subr.bf16.mxu1 %v3131_v0 }
 0x883   :  { %2793 = vmatpush3.bf16.msra.mxu1 %v3260_v10 }
 0x884   :  { %2794 = vmatprep.subr.bf16.mxu1 %v3131_v0 }
 0x886   :  { %2529 = vmatmul.mubr.msk.f32.vlgmr.msra.gmra.mrb[8].mxu1 %vm245_vm3, %v758_v19 }
 0x887   :  { %2796 = vmatpush3.bf16.msra.mxu1 %v3289_v31  ;;  %2547 = vmatprep.mubr.msk.f32.mxu1 %vm3132_vm0, %v3133_v1 }
 0x888   :  { %2797 = vmatprep.subr.bf16.mxu1 %v3131_v0 }
 0x88b   :  { %2799 = vmatpush3.bf16.msra.mxu1 %v3300_v36 }
 0x88c   :  { %2800 = vmatprep.subr.bf16.mxu1 %v3131_v0 }
 0x88f   :  { %2802 = vmatpush3.bf16.msra.mxu1 %v3312_v41 }
 0x890   :  { %2803 = vmatprep.subr.bf16.mxu1 %v3131_v0 }
 0x893   :  { %2805 = vmatpush3.bf16.msra.mxu1 %v3322_v46 }
 0x894   :  { %2824 = vmatprep.subr.bf16.mxu1 %v3131_v0 }
 0x951   :  { %v833_v22 = vpop.f32.mrb[6].mxu1 }
 0x952   :  { %v834_v23 = vadd.f32 %v3366_v58, %v833_v22  ;;  %v2519_v24 = vpop.f32.mrb[7].mxu1 }
 0x954   :  { %2968 = vtanh.f32 %v834_v23  ;;  %v2228_v33 = vmul.f32 -1.442695, %v834_v23 }
 0x959   :  { %v934_v26 = vpop.f32.mrb[8].mxu1 }
 0x95a   :  { %v938_v28 = vadd.f32 %v934_v26, %v203_v25  ;;  %v2530_v29 = vpop.f32.mrb[9].mxu1 }
 0x95c   :  { %2970 = vtanh.f32 %v938_v28  ;;  %v2230_v34 = vmul.f32 -1.442695, %v938_v28 }
 0x95d   :  { %2972 = vpow2.f32 %v2228_v33 }
 0x95e   :  { %v2969_v30 = vpop.eup %2968  ;;  %2974 = vpow2.f32 %v2230_v34 }
 0x95f   :  { %846 = vrot.lane.b32.xlu0 %v2969_v30, %s3134_s17 }
 0x966   :  { %v2971_v27 = vpop.eup %2970 }
 0x967   :  { %948 = vrot.lane.b32.xlu1 %v2971_v27, %s3134_s17  ;;  %v2973_v35 = vpop.eup %2972 }
 0x968   :  { %v840_v37 = vadd.f32 1.0, %v2973_v35  ;;  %v2975_v38 = vpop.eup %2974 }
 0x969   :  { %v942_v39 = vadd.f32 1.0, %v2975_v38 }
 0x96a   :  { %2976 = vrcp.f32 %v840_v37 }
 0x96b   :  { %2978 = vrcp.f32 %v942_v39 }
 0x974   :  { %v2977_v49 = vpop.eup %2976 }
 0x975   :  { %v2979_v43 = vpop.eup %2978  ;;  %v844_v47 = vmul.f32 %v2977_v49, %v647_v11 }
 0x976   :  { %v946_v50 = vmul.f32 %v2979_v43, %v3414_v7  ;;  %v208_v7 = vadd.f32 %v3278_v12, %v3336_v52 }
 0x9d1   :  { %v847_v40 = vpop.permute.xlu0 %846 }
 0x9d2   :  { %v849_v42 = vmul.f32 %v2977_v49, %v847_v40 }
 0x9d4   :  { %851 = vrot.lane.b32.xlu0 %v849_v42, %s3135_s3 }
 0x9d9   :  { %v949_v44 = vpop.permute.xlu1 %948 }
 0x9da   :  { %v951_v45 = vmul.f32 %v2979_v43, %v949_v44 }
 0x9dc   :  { %953 = vrot.lane.b32.xlu1 %v951_v45, %s3135_s3 }
 0xa46   :  { %v852_v48 = vpop.permute.xlu0 %851 }
 0xa47   :  { %v3451_v55 = vadd.f32 %v852_v48, %v844_v47 }
 0xa49   :  { %2980 = vtanh.f32 %v3451_v55 }
 0xa4e   :  { %v954_v56 = vpop.permute.xlu1 %953 }
 0xa4f   :  { %v956_v57 = vadd.f32 %v954_v56, %v946_v50 }
 0xa51   :  { %2982 = vtanh.f32 %v956_v57 }
 0xa53   :  { %v2981_v59 = vpop.eup %2980 }
 0xa54   :  { %857 = vrot.lane.b32.xlu0 %v2981_v59, %s3134_s17 }
 0xa5b   :  { %v2983_v60 = vpop.eup %2982 }
 0xa5c   :  { %959 = vrot.lane.b32.xlu1 %v2983_v60, %s3134_s17 }
 0xac6   :  { %v858_v61 = vpop.permute.xlu0 %857 }
 0xac7   :  { %v3457_v62 = vmul.f32 %v2977_v49, %v858_v61 }
 0xac9   :  { %967 = vrot.lane.b32.xlu1 %v3457_v62, %s3134_s17 }
 0xace   :  { %v960_v63 = vpop.permute.xlu1 %959 }
 0xacf   :  { %v962_v2 = vmul.f32 %v2979_v43, %v960_v63 }
 0xad1   :  { %964 = vrot.lane.b32.xlu0 %v962_v2, %s3135_s3 }
 0xb3b   :  { %v968_v3 = vpop.permute.xlu1 %967 }
 0xb43   :  { %v965_v4 = vpop.permute.xlu0 %964 }
 0xb44   :  { %v970_v6 = vsel %vm245_vm3, %v965_v4, %v968_v3  ;;  %2559 = vmatmul.mubr.msk.f32.vlgmr.msra.gmra.mrb[12].mxu0 %vm245_vm3, %v965_v4 }
 0xb45   :  { %2548 = vmatmul.mubr.msk.f32.vlgmr.msra.gmra.mrb[10].mxu1 %vm349_vm4, %v970_v6  ;;  %2814 = vmatpush3.bf16.msra.mxu0 %v3289_v31 }
 0xb46   :  { %2815 = vmatprep.subr.bf16.mxu0 %v3131_v0  ;;  %2826 = vmatpush3.bf16.msra.mxu1 %v3249_v5 }
 0xb47   :  { %2827 = vmatprep.subr.bf16.mxu1 %v3131_v0  ;;  %2588 = vmatprep.mubr.msk.f32.mxu1 %vm3132_vm0, %v3133_v1 }
 0xb48   :  { %2577 = vmatprep.mubr.msk.f32.mxu0 %vm3132_vm0, %v3133_v1 }
 0xb49   :  { %2817 = vmatpush3.bf16.msra.mxu0 %v3300_v36 }
 0xb4a   :  { %2818 = vmatprep.subr.bf16.mxu0 %v3131_v0  ;;  %2829 = vmatpush3.bf16.msra.mxu1 %v3260_v10 }
 0xb4b   :  { %2830 = vmatprep.subr.bf16.mxu1 %v3131_v0 }
 0xb4d   :  { %2820 = vmatpush3.bf16.msra.mxu0 %v3312_v41 }
 0xb4e   :  { %2821 = vmatprep.subr.bf16.mxu0 %v3131_v0 }
 0xb51   :  { %2823 = vmatpush3.bf16.msra.mxu0 %v3322_v46 }
 0xb52   :  { %2842 = vmatprep.subr.bf16.mxu0 %v3131_v0 }
 0xc17   :  { %v1141_v8 = vpop.f32.mrb[12].mxu0 }
 0xc18   :  { %v1145_v9 = vadd.f32 %v1141_v8, %v208_v7  ;;  %v1040_v11 = vpop.f32.mrb[10].mxu1  ;;  %v2560_v13 = vpop.f32.mrb[13].mxu0 }
 0xc19   :  { %v1041_v14 = vadd.f32 %v3366_v58, %v1040_v11  ;;  %v2549_v15 = vpop.f32.mrb[11].mxu1 }
 0xc1a   :  { %2984 = vtanh.f32 %v1145_v9  ;;  %v2234_v19 = vmul.f32 -1.442695, %v1145_v9 }
 0xc1b   :  { %2986 = vtanh.f32 %v1041_v14  ;;  %v2232_v20 = vmul.f32 -1.442695, %v1041_v14 }
 0xc1c   :  { %2988 = vpow2.f32 %v2234_v19 }
 0xc1d   :  { %2990 = vpow2.f32 %v2232_v20 }
 0xc24   :  { %v2985_v16 = vpop.eup %2984 }
 0xc25   :  { %v2987_v17 = vpop.eup %2986  ;;  %1155 = vrot.lane.b32.xlu1 %v2985_v16, %s3134_s17 }
 0xc26   :  { %1053 = vrot.lane.b32.xlu0 %v2987_v17, %s3134_s17  ;;  %v2989_v52 = vpop.eup %2988 }
 0xc27   :  { %v2991_v21 = vpop.eup %2990  ;;  %v1149_v22 = vadd.f32 1.0, %v2989_v52 }
 0xc28   :  { %v1047_v23 = vadd.f32 1.0, %v2991_v21 }
 0xc29   :  { %2992 = vrcp.f32 %v1149_v22 }
 0xc2a   :  { %2994 = vrcp.f32 %v1047_v23 }
 0xc33   :  { %v2993_v24 = vpop.eup %2992 }
 0xc34   :  { %v2995_v26 = vpop.eup %2994  ;;  %v1153_v27 = vmul.f32 %v2993_v24, %v956_v57 }
 0xc35   :  { %v1051_v34 = vmul.f32 %v2995_v26, %v3451_v55  ;;  %v213_v55 = vadd.f32 %v3334_v51, %v3278_v12 }
 0xc97   :  { %v1156_v25 = vpop.permute.xlu1 %1155 }
 0xc98   :  { %v1158_v28 = vmul.f32 %v2993_v24, %v1156_v25  ;;  %v1054_v29 = vpop.permute.xlu0 %1053 }
 0xc99   :  { %v1056_v30 = vmul.f32 %v2995_v26, %v1054_v29 }
 0xc9a   :  { %1160 = vrot.lane.b32.xlu1 %v1158_v28, %s3135_s3 }
 0xc9b   :  { %1058 = vrot.lane.b32.xlu0 %v1056_v30, %s3135_s3 }
 0xd0c   :  { %v1161_v33 = vpop.permute.xlu1 %1160 }
 0xd0d   :  { %v3489_v35 = vadd.f32 %v1161_v33, %v1153_v27  ;;  %v1059_v37 = vpop.permute.xlu0 %1058 }
 0xd0e   :  { %v3491_v38 = vadd.f32 %v1059_v37, %v1051_v34 }
 0xd0f   :  { %2996 = vtanh.f32 %v3489_v35 }
 0xd10   :  { %2998 = vtanh.f32 %v3491_v38 }
 0xd19   :  { %v2997_v39 = vpop.eup %2996 }
 0xd1a   :  { %v2999_v49 = vpop.eup %2998  ;;  %1166 = vrot.lane.b32.xlu1 %v2997_v39, %s3134_s17 }
 0xd1b   :  { %1064 = vrot.lane.b32.xlu0 %v2999_v49, %s3134_s17 }
 0xd8c   :  { %v1167_v40 = vpop.permute.xlu1 %1166 }
 0xd8d   :  { %v1169_v42 = vmul.f32 %v2993_v24, %v1167_v40  ;;  %v1065_v43 = vpop.permute.xlu0 %1064 }
 0xd8e   :  { %v3497_v44 = vmul.f32 %v2995_v26, %v1065_v43 }
 0xd8f   :  { %1171 = vrot.lane.b32.xlu0 %v1169_v42, %s3135_s3 }
 0xd90   :  { %1174 = vrot.lane.b32.xlu1 %v3497_v44, %s3134_s17 }
 0xe01   :  { %v1172_v45 = vpop.permute.xlu0 %1171 }
 0xe02   :  { %2589 = vmatmul.mubr.msk.f32.vlgmr.msra.gmra.mrb[12].mxu1 %vm245_vm3, %v1172_v45  ;;  %v1175_v47 = vpop.permute.xlu1 %1174 }
 0xe03   :  { %v1177_v48 = vsel %vm245_vm3, %v1172_v45, %v1175_v47  ;;  %2832 = vmatpush3.bf16.msra.mxu1 %v3289_v31  ;;  %2607 = vmatprep.mubr.msk.f32.mxu1 %vm3132_vm0, %v3133_v1 }
 0xe04   :  { %2578 = vmatmul.mubr.msk.f32.vlgmr.msra.gmra.mrb[14].mxu0 %vm349_vm4, %v1177_v48  ;;  %2833 = vmatprep.subr.bf16.mxu1 %v3131_v0 }
 0xe05   :  { %2844 = vmatpush3.bf16.msra.mxu0 %v3249_v5  ;;  %2618 = vmatprep.mubr.msk.f32.mxu0 %vm3132_vm0, %v3133_v1 }
 0xe06   :  { %2845 = vmatprep.subr.bf16.mxu0 %v3131_v0 }
 0xe07   :  { %2835 = vmatpush3.bf16.msra.mxu1 %v3300_v36 }
 0xe08   :  { %2836 = vmatprep.subr.bf16.mxu1 %v3131_v0 }
 0xe09   :  { %2847 = vmatpush3.bf16.msra.mxu0 %v3260_v10 }
 0xe0a   :  { %2848 = vmatprep.subr.bf16.mxu0 %v3131_v0 }
 0xe0b   :  { %2838 = vmatpush3.bf16.msra.mxu1 %v3312_v41 }
 0xe0c   :  { %2839 = vmatprep.subr.bf16.mxu1 %v3131_v0 }
 0xe0f   :  { %2841 = vmatpush3.bf16.msra.mxu1 %v3322_v46 }
 0xe10   :  { %2860 = vmatprep.subr.bf16.mxu1 %v3131_v0 }
 0xed5   :  { %v1348_v50 = vpop.f32.mrb[12].mxu1 }
 0xed6   :  { %v1352_v56 = vadd.f32 %v1348_v50, %v213_v55  ;;  %v2590_v57 = vpop.f32.mrb[13].mxu1 }
 0xed7   :  { %v1247_v59 = vpop.f32.mrb[14].mxu0 }
 0xed8   :  { %3000 = vtanh.f32 %v1352_v56  ;;  %v1248_v60 = vadd.f32 %v3366_v58, %v1247_v59  ;;  %v2579_v61 = vpop.f32.mrb[15].mxu0  ;;  %v2238_v3 = vmul.f32 -1.442695, %v1352_v56 }
 0xeda   :  { %3002 = vtanh.f32 %v1248_v60  ;;  %v2236_v4 = vmul.f32 -1.442695, %v1248_v60 }
 0xedb   :  { %3004 = vpow2.f32 %v2238_v3 }
 0xedc   :  { %3006 = vpow2.f32 %v2236_v4 }
 0xee2   :  { %v3001_v63 = vpop.eup %3000 }
 0xee3   :  { %1362 = vrot.lane.b32.xlu1 %v3001_v63, %s3134_s17 }
 0xee4   :  { %v3003_v2 = vpop.eup %3002 }
 0xee5   :  { %1260 = vrot.lane.b32.xlu0 %v3003_v2, %s3134_s17  ;;  %v3005_v51 = vpop.eup %3004 }
 0xee6   :  { %v3007_v6 = vpop.eup %3006  ;;  %v1356_v7 = vadd.f32 1.0, %v3005_v51 }
 0xee7   :  { %v1254_v8 = vadd.f32 1.0, %v3007_v6 }
 0xee8   :  { %3008 = vrcp.f32 %v1356_v7 }
 0xee9   :  { %3010 = vrcp.f32 %v1254_v8 }
 0xef2   :  { %v3009_v9 = vpop.eup %3008 }
 0xef3   :  { %v3011_v14 = vpop.eup %3010  ;;  %v1360_v17 = vmul.f32 %v3009_v9, %v3489_v35 }
 0xef4   :  { %v1258_v52 = vmul.f32 %v3011_v14, %v3491_v38 }
 0xf55   :  { %v1363_v11 = vpop.permute.xlu1 %1362 }
 0xf56   :  { %v1365_v13 = vmul.f32 %v3009_v9, %v1363_v11 }
 0xf57   :  { %v1261_v15 = vpop.permute.xlu0 %1260 }
 0xf58   :  { %1367 = vrot.lane.b32.xlu1 %v1365_v13, %s3135_s3  ;;  %v1263_v16 = vmul.f32 %v3011_v14, %v1261_v15 }
 0xf5a   :  { %1265 = vrot.lane.b32.xlu0 %v1263_v16, %s3135_s3 }
 0xfca   :  { %v1368_v19 = vpop.permute.xlu1 %1367 }
 0xfcb   :  { %v3529_v20 = vadd.f32 %v1368_v19, %v1360_v17 }
 0xfcc   :  { %v1266_v21 = vpop.permute.xlu0 %1265 }
 0xfcd   :  { %3012 = vtanh.f32 %v3529_v20  ;;  %v3533_v22 = vadd.f32 %v1266_v21, %v1258_v52 }
 0xfcf   :  { %3014 = vtanh.f32 %v3533_v22 }
 0xfd7   :  { %v3013_v23 = vpop.eup %3012 }
 0xfd8   :  { %1373 = vrot.lane.b32.xlu1 %v3013_v23, %s3134_s17 }
 0xfd9   :  { %v3015_v24 = vpop.eup %3014 }
 0xfda   :  { %1271 = vrot.lane.b32.xlu0 %v3015_v24, %s3134_s17 }
0x104a   :  { %v1374_v25 = vpop.permute.xlu1 %1373 }
0x104b   :  { %v1376_v26 = vmul.f32 %v3009_v9, %v1374_v25 }
0x104c   :  { %v1272_v28 = vpop.permute.xlu0 %1271 }
0x104d   :  { %1378 = vrot.lane.b32.xlu0 %v1376_v26, %s3135_s3  ;;  %v3539_v29 = vmul.f32 %v3011_v14, %v1272_v28 }
0x104f   :  { %1381 = vrot.lane.b32.xlu1 %v3539_v29, %s3134_s17 }
0x10bf   :  { %v1379_v30 = vpop.permute.xlu0 %1378 }
0x10c0   :  { %2619 = vmatmul.mubr.msk.f32.vlgmr.msra.gmra.mrb[16].mxu0 %vm245_vm3, %v1379_v30 }
0x10c1   :  { %2850 = vmatpush3.bf16.msra.mxu0 %v3289_v31  ;;  %2637 = vmatprep.mubr.msk.f32.mxu0 %vm3132_vm0, %v3133_v1  ;;  %v1382_v27 = vpop.permute.xlu1 %1381 }
0x10c2   :  { %2851 = vmatprep.subr.bf16.mxu0 %v3131_v0  ;;  %v1384_v33 = vsel %vm245_vm3, %v1379_v30, %v1382_v27 }
0x10c3   :  { %2608 = vmatmul.mubr.msk.f32.vlgmr.msra.gmra.mrb[14].mxu1 %vm349_vm4, %v1384_v33 }
0x10c4   :  { %2862 = vmatpush3.bf16.msra.mxu1 %v3249_v5  ;;  %2648 = vmatprep.mubr.msk.f32.mxu1 %vm3132_vm0, %v3133_v1  ;;  %v218_v5 = vadd.f32 %v3278_v12, %v3340_v54 }
0x10c5   :  { %2853 = vmatpush3.bf16.msra.mxu0 %v3300_v36  ;;  %2863 = vmatprep.subr.bf16.mxu1 %v3131_v0 }
0x10c6   :  { %2854 = vmatprep.subr.bf16.mxu0 %v3131_v0 }
0x10c8   :  { %2865 = vmatpush3.bf16.msra.mxu1 %v3260_v10 }
0x10c9   :  { %2856 = vmatpush3.bf16.msra.mxu0 %v3312_v41  ;;  %2866 = vmatprep.subr.bf16.mxu1 %v3131_v0 }
0x10ca   :  { %2857 = vmatprep.subr.bf16.mxu0 %v3131_v0 }
0x10cd   :  { %2859 = vmatpush3.bf16.msra.mxu0 %v3322_v46 }
0x1193   :  { %v1555_v34 = vpop.f32.mrb[16].mxu0 }
0x1194   :  { %v1559_v35 = vadd.f32 %v1555_v34, %v218_v5  ;;  %v2620_v37 = vpop.f32.mrb[17].mxu0 }
0x1196   :  { %3016 = vtanh.f32 %v1559_v35  ;;  %v1454_v38 = vpop.f32.mrb[14].mxu1  ;;  %v2242_v42 = vmul.f32 -1.442695, %v1559_v35 }
0x1197   :  { %v1455_v39 = vadd.f32 %v3366_v58, %v1454_v38  ;;  %v2609_v49 = vpop.f32.mrb[15].mxu1 }
0x1199   :  { %3018 = vtanh.f32 %v1455_v39  ;;  %v2240_v43 = vmul.f32 -1.442695, %v1455_v39 }
0x119a   :  { %3020 = vpow2.f32 %v2242_v42 }
0x119b   :  { %3022 = vpow2.f32 %v2240_v43 }
0x11a0   :  { %v3017_v40 = vpop.eup %3016 }
0x11a1   :  { %1569 = vrot.lane.b32.xlu1 %v3017_v40, %s3134_s17 }
0x11a3   :  { %v3019_v10 = vpop.eup %3018 }
0x11a4   :  { %1467 = vrot.lane.b32.xlu0 %v3019_v10, %s3134_s17  ;;  %v3021_v54 = vpop.eup %3020 }
0x11a5   :  { %v1563_v45 = vadd.f32 1.0, %v3021_v54  ;;  %v3023_v47 = vpop.eup %3022 }
0x11a6   :  { %v1461_v48 = vadd.f32 1.0, %v3023_v47 }
0x11a7   :  { %3024 = vrcp.f32 %v1563_v45 }
0x11a8   :  { %3026 = vrcp.f32 %v1461_v48 }
0x11b1   :  { %v3025_v55 = vpop.eup %3024 }
0x11b2   :  { %v3027_v57 = vpop.eup %3026  ;;  %v1567_v61 = vmul.f32 %v3025_v55, %v3529_v20 }
0x11b3   :  { %v1465_v3 = vmul.f32 %v3027_v57, %v3533_v22 }
0x1213   :  { %v1570_v50 = vpop.permute.xlu1 %1569 }
0x1214   :  { %v1572_v56 = vmul.f32 %v3025_v55, %v1570_v50 }
0x1216   :  { %1574 = vrot.lane.b32.xlu1 %v1572_v56, %s3135_s3  ;;  %v1468_v59 = vpop.permute.xlu0 %1467 }
0x1217   :  { %v1470_v60 = vmul.f32 %v3027_v57, %v1468_v59 }
0x1219   :  { %1472 = vrot.lane.b32.xlu0 %v1470_v60, %s3135_s3 }
0x1288   :  { %v1575_v63 = vpop.permute.xlu1 %1574 }
0x1289   :  { %v1577_v2 = vadd.f32 %v1575_v63, %v1567_v61 }
0x128b   :  { %3028 = vtanh.f32 %v1577_v2  ;;  %v1473_v4 = vpop.permute.xlu0 %1472 }
0x128c   :  { %v1475_v51 = vadd.f32 %v1473_v4, %v1465_v3 }
0x128e   :  { %3030 = vtanh.f32 %v1475_v51 }
0x1295   :  { %v3029_v6 = vpop.eup %3028 }
0x1296   :  { %1580 = vrot.lane.b32.xlu1 %v3029_v6, %s3134_s17  ;;  %v1910_v6 = vld [vmem:[#allocation7 + $0x8] sm:$0xff] }
0x1298   :  { %v3031_v7 = vpop.eup %3030 }
0x1299   :  { %1478 = vrot.lane.b32.xlu0 %v3031_v7, %s3134_s17 }
0x1308   :  { %v1581_v8 = vpop.permute.xlu1 %1580 }
0x1309   :  { %v1583_v9 = vmul.f32 %v3025_v55, %v1581_v8 }
0x130b   :  { %1585 = vrot.lane.b32.xlu0 %v1583_v9, %s3135_s3  ;;  %v1479_v11 = vpop.permute.xlu0 %1478  ;;  %v1912_v9 = vld [vmem:[#allocation7 + $0x18] sm:$0xff] }
0x130c   :  { %v3573_v13 = vmul.f32 %v3027_v57, %v1479_v11 }
0x130e   :  { %1588 = vrot.lane.b32.xlu1 %v3573_v13, %s3134_s17 }
0x137d   :  { %v1586_v14 = vpop.permute.xlu0 %1585 }
0x137e   :  { %2649 = vmatmul.mubr.msk.f32.vlgmr.msra.gmra.mrb[16].mxu1 %vm245_vm3, %v1586_v14 }
0x137f   :  { %2868 = vmatpush3.bf16.msra.mxu1 %v3289_v31  ;;  %2667 = vmatprep.mubr.msk.f32.mxu1 %vm3132_vm0, %v3133_v1  ;;  %v223_v1 = vadd.f32 %v3338_v53, %v3278_v12 }
0x1380   :  { %2869 = vmatprep.subr.bf16.mxu1 %v3131_v0  ;;  %v1589_v15 = vpop.permute.xlu1 %1588 }
0x1381   :  { %v1591_v16 = vsel %vm245_vm3, %v1586_v14, %v1589_v15 }
0x1382   :  { %2638 = vmatmul.mubr.msk.f32.vlgmr.msra.gmra.mrb[18].mxu0 %vm349_vm4, %v1591_v16 }
0x1383   :  { %2871 = vmatpush3.bf16.msra.mxu1 %v3300_v36 }
0x1384   :  { %2872 = vmatprep.subr.bf16.mxu1 %v3131_v0 }
0x1387   :  { %2874 = vmatpush3.bf16.msra.mxu1 %v3312_v41 }
0x1388   :  { %2875 = vmatprep.subr.bf16.mxu1 %v3131_v0 }
0x138b   :  { %2877 = vmatpush3.bf16.msra.mxu1 %v3322_v46 }
0x1451   :  { %v1762_v31 = vpop.f32.mrb[16].mxu1 }
0x1452   :  { %v1766_v17 = vadd.f32 %v1762_v31, %v223_v1  ;;  %v2650_v19 = vpop.f32.mrb[17].mxu1  ;;  %v2057_v1 = vld [vmem:[%s3722_s8] sm:$0xff]  ;;  %v2058_v31 = vld [vmem:[%s3722_s8 + $0x8] sm:$0xff] }
0x1454   :  { %3032 = vtanh.f32 %v1766_v17  ;;  %v2246_v0 = vmul.f32 -1.442695, %v1766_v17  ;;  %v2886_v17 = vpack.c.bf16 %v2058_v31, %v2057_v1 }
0x1455   :  { %v1661_v20 = vpop.f32.mrb[18].mxu0 }
0x1456   :  { %v1662_v52 = vadd.f32 %v3366_v58, %v1661_v20  ;;  %v2639_v21 = vpop.f32.mrb[19].mxu0 }
0x1458   :  { %3034 = vtanh.f32 %v1662_v52  ;;  %v2244_v46 = vmul.f32 -1.442695, %v1662_v52  ;;  %v2060_v52 = vld [vmem:[%s3722_s8 + $0x18] sm:$0xff] }
0x1459   :  { %3036 = vpow2.f32 %v2246_v0  ;;  %v2061_v0 = vld [vmem:[%s3722_s8 + $0x20] sm:$0xff] }
0x145a   :  { %3038 = vpow2.f32 %v2244_v46  ;;  %v2062_v46 = vld [vmem:[%s3722_s8 + $0x28] sm:$0xff] }
0x145e   :  { %v3033_v36 = vpop.eup %3032 }
0x145f   :  { %1776 = vrot.lane.b32.xlu1 %v3033_v36, %s3134_s17 }
0x1462   :  { %v3035_v41 = vpop.eup %3034 }
0x1463   :  { %1674 = vrot.lane.b32.xlu0 %v3035_v41, %s3134_s17  ;;  %v3037_v12 = vpop.eup %3036 }
0x1464   :  { %v1770_v53 = vadd.f32 1.0, %v3037_v12  ;;  %v3039_v22 = vpop.eup %3038 }
0x1465   :  { %v1668_v23 = vadd.f32 1.0, %v3039_v22 }
0x1466   :  { %3040 = vrcp.f32 %v1770_v53  ;;  %v2894_v53 = vpack.c.bf16 %v2062_v46, %v2061_v0 }
0x1467   :  { %3042 = vrcp.f32 %v1668_v23  ;;  %v2063_v23 = vld [vmem:[%s3722_s8 + $0x30] sm:$0xff] }
0x1470   :  { %v3041_v24 = vpop.eup %3040 }
0x1471   :  { %v3043_v28 = vpop.eup %3042  ;;  %v1774_v33 = vmul.f32 %v3041_v24, %v1577_v2 }
0x1472   :  { %v1672_v35 = vmul.f32 %v3043_v28, %v1475_v51  ;;  %v1909_v51 = vld [vmem:[#allocation7] sm:$0xff] }
0x1473   :  { %v2878_v7 = vpack.c.bf16 %v1910_v6, %v1909_v51 }
0x1475   :  { %2879 = vmatprep.subr.bf16.mxu0 %v2878_v7 }
0x1476   :  { %2881 = vmatpush3.bf16.msra.mxu0 %v2878_v7 }
0x14d1   :  { %v1777_v25 = vpop.permute.xlu1 %1776 }
0x14d2   :  { %v1779_v26 = vmul.f32 %v3041_v24, %v1777_v25 }
0x14d4   :  { %1781 = vrot.lane.b32.xlu1 %v1779_v26, %s3135_s3 }
0x14d5   :  { %v1675_v30 = vpop.permute.xlu0 %1674 }
0x14d6   :  { %v1677_v27 = vmul.f32 %v3043_v28, %v1675_v30  ;;  %v2065_v30 = vld [vmem:[%s3722_s8 + $0x40] sm:$0xff] }
0x14d8   :  { %1679 = vrot.lane.b32.xlu0 %v1677_v27, %s3135_s3  ;;  %v2066_v27 = vld [vmem:[%s3722_s8 + $0x48] sm:$0xff] }
0x1546   :  { %v1782_v5 = vpop.permute.xlu1 %1781 }
0x1547   :  { %v1784_v34 = vadd.f32 %v1782_v5, %v1774_v33  ;;  %v2902_v5 = vpack.c.bf16 %v2066_v27, %v2065_v30 }
0x1549   :  { %3044 = vtanh.f32 %v1784_v34  ;;  %v2067_v34 = vld [vmem:[%s3722_s8 + $0x50] sm:$0xff] }
0x154a   :  { %v1680_v37 = vpop.permute.xlu0 %1679 }
0x154b   :  { %v1682_v38 = vadd.f32 %v1680_v37, %v1672_v35  ;;  %v2068_v35 = vld [vmem:[%s3722_s8 + $0x58] sm:$0xff] }
0x154c   :  { %v2906_v37 = vpack.c.bf16 %v2068_v35, %v2067_v34 }
0x154d   :  { %3046 = vtanh.f32 %v1682_v38 }
0x1553   :  { %v3045_v39 = vpop.eup %3044 }
0x1554   :  { %1787 = vrot.lane.b32.xlu1 %v3045_v39, %s3134_s17  ;;  %v2070_v39 = vld [vmem:[%s3722_s8 + $0x68] sm:$0xff] }
0x1557   :  { %v3047_v49 = vpop.eup %3046 }
0x1558   :  { %1685 = vrot.lane.b32.xlu0 %v3047_v49, %s3134_s17 }
0x15c6   :  { %v1788_v40 = vpop.permute.xlu1 %1787 }
0x15c7   :  { %v1790_v10 = vmul.f32 %v3041_v24, %v1788_v40  ;;  %v2064_v24 = vld [vmem:[%s3722_s8 + $0x38] sm:$0xff]  ;;  %v2071_v40 = vld [vmem:[%s3722_s8 + $0x70] sm:$0xff] }
0x15c8   :  { %v2898_v26 = vpack.c.bf16 %v2064_v24, %v2063_v23 }
0x15c9   :  { %1792 = vrot.lane.b32.xlu0 %v1790_v10, %s3135_s3  ;;  %v2072_v10 = vld [vmem:[%s3722_s8 + $0x78] sm:$0xff] }
0x15ca   :  { %v1686_v42 = vpop.permute.xlu0 %1685 }
0x15cb   :  { %v1688_v43 = vmul.f32 %v3043_v28, %v1686_v42  ;;  %v2914_v42 = vpack.c.bf16 %v2072_v10, %v2071_v40 }
0x15cd   :  { %1795 = vrot.lane.b32.xlu1 %v1688_v43, %s3134_s17 }
0x163b   :  { %v1793_v54 = vpop.permute.xlu0 %1792 }
0x163f   :  { %v1796_v45 = vpop.permute.xlu1 %1795 }
0x1640   :  { %v1798_v47 = vsel %vm245_vm3, %v1793_v54, %v1796_v45  ;;  %v2249_v45 = vld [vmem:[%s3721_s7] ss:$0 sm:$0xff] }
0x1641   :  { %2668 = vmatmul.mubr.msk.f32.vlgmr.msra.gmra.mrb[18].mxu1 %vm349_vm4, %v1798_v47 }
0x1714   :  { %v1868_v48 = vpop.f32.mrb[18].mxu1 }
0x1715   :  { %v1869_v55 = vadd.f32 %v3366_v58, %v1868_v48  ;;  %v2669_v50 = vpop.f32.mrb[19].mxu1 }
0x1717   :  { %3048 = vtanh.f32 %v1869_v55  ;;  %v2248_v57 = vmul.f32 -1.442695, %v1869_v55 }
0x1719   :  { %3050 = vpow2.f32 %v2248_v57 }
0x1721   :  { %v3049_v56 = vpop.eup %3048 }
0x1722   :  { %1881 = vrot.lane.b32.xlu0 %v3049_v56, %s3134_s17 }
0x1723   :  { %v3051_v59 = vpop.eup %3050 }
0x1724   :  { %v1875_v60 = vadd.f32 1.0, %v3051_v59 }
0x1726   :  { %3052 = vrcp.f32 %v1875_v60 }
0x1730   :  { %v3053_v61 = vpop.eup %3052 }
0x1731   :  { %v1879_v58 = vmul.f32 %v3053_v61, %v1682_v38  ;;  %v2069_v38 = vld [vmem:[%s3722_s8 + $0x60] sm:$0xff] }
0x1732   :  { %v2910_v49 = vpack.c.bf16 %v2070_v39, %v2069_v38 }
0x1794   :  { %v1882_v63 = vpop.permute.xlu0 %1881 }
0x1795   :  { %v1884_v2 = vmul.f32 %v3053_v61, %v1882_v63 }
0x1797   :  { %1886 = vrot.lane.b32.xlu1 %v1884_v2, %s3135_s3 }
0x179b   :  { %448 = vrot.lane.b32.xlu1 %v3382_v32, %s3135_s3  ;;  %v1911_v32 = vld [vmem:[#allocation7 + $0x10] sm:$0xff] }
0x179f   :  { %862 = vrot.lane.b32.xlu1 %v3457_v62, %s3135_s3  ;;  %v2882_v62 = vpack.c.bf16 %v1912_v9, %v1911_v32 }
0x17a1   :  { %2883 = vmatprep.subr.bf16.mxu0 %v2882_v62 }
0x17a2   :  { %2885 = vmatpush3.bf16.msra.mxu0 %v2882_v62 }
0x17a3   :  { %1276 = vrot.lane.b32.xlu1 %v3539_v29, %s3135_s3  ;;  %2887 = vmatprep.subr.bf16.mxu0 %v2886_v17 }
0x17a7   :  { %1690 = vrot.lane.b32.xlu1 %v1688_v43, %s3135_s3 }
0x1809   :  { %v1887_v3 = vpop.permute.xlu1 %1886 }
0x180a   :  { %v1889_v4 = vadd.f32 %v1887_v3, %v1879_v58 }
0x180c   :  { %3054 = vtanh.f32 %v1889_v4 }
0x180d   :  { %v449_v8 = vpop.permute.xlu1 %448 }
0x180e   :  { %451 = vst.msk [vmem:[#allocation2] sm:$0xff] %vm245_vm3, %v449_v8 }
0x1811   :  { %v863_v11 = vpop.permute.xlu1 %862 }
0x1812   :  { %865 = vst.msk [vmem:[#allocation2 + $0x10] sm:$0xff] %vm245_vm3, %v863_v11 }
0x1815   :  { %v1277_v29 = vpop.permute.xlu1 %1276  ;;  %v1901_v14 = vld [vmem:[#allocation2] sm:$0xff] }
0x1816   :  { %v3055_v15 = vpop.eup %3054  ;;  %1279 = vst.msk [vmem:[#allocation2 + $0x20] sm:$0xff] %vm245_vm3, %v1277_v29  ;;  %2678 = vmatprep.mubr.msk.f32.mxu0 %vm245_vm3, %v1901_v14 }
0x1817   :  { %1892 = vrot.lane.b32.xlu0 %v3055_v15, %s3134_s17  ;;  %v2258_v15 = vld [vmem:[%s3723_s9] ss:$0 sm:$0xff] }
0x1819   :  { %v1691_v16 = vpop.permute.xlu1 %1690  ;;  %v1903_v12 = vld [vmem:[#allocation2 + $0x10] sm:$0xff] }
0x181a   :  { %1693 = vst.msk [vmem:[#allocation2 + $0x30] sm:$0xff] %vm245_vm3, %v1691_v16 }
0x181b   :  { %655 = vrot.lane.b32.xlu0 %v3421_v18, %s3135_s3 }
0x181d   :  { %v1905_v25 = vld [vmem:[#allocation2 + $0x20] sm:$0xff] }
0x181f   :  { %1069 = vrot.lane.b32.xlu0 %v3497_v44, %s3135_s3 }
0x1821   :  { %v1907_v33 = vld [vmem:[#allocation2 + $0x30] sm:$0xff] }
0x1823   :  { %1483 = vrot.lane.b32.xlu0 %v3573_v13, %s3135_s3  ;;  %v2059_v13 = vld [vmem:[%s3722_s8 + $0x10] sm:$0xff] }
0x1824   :  { %v2890_v21 = vpack.c.bf16 %v2060_v52, %v2059_v13 }
0x1889   :  { %v1893_v19 = vpop.permute.xlu0 %1892 }
0x188a   :  { %v1895_v20 = vmul.f32 %v3053_v61, %v1893_v19 }
0x188c   :  { %1897 = vrot.lane.b32.xlu0 %v1895_v20, %s3135_s3 }
0x188d   :  { %v656_v18 = vpop.permute.xlu0 %655 }
0x188e   :  { %658 = vst.msk [vmem:[#allocation2 + $0x8] sm:$0xff] %vm245_vm3, %v656_v18 }
0x1891   :  { %v1070_v44 = vpop.permute.xlu0 %1069 }
0x1892   :  { %1072 = vst.msk [vmem:[#allocation2 + $0x18] sm:$0xff] %vm245_vm3, %v1070_v44 }
0x1895   :  { %v1484_v36 = vpop.permute.xlu0 %1483  ;;  %v1902_v41 = vld [vmem:[#allocation2 + $0x8] sm:$0xff] }
0x1896   :  { %1486 = vst.msk [vmem:[#allocation2 + $0x28] sm:$0xff] %vm245_vm3, %v1484_v36  ;;  %2679 = vmatmul.mubr.msk.f32.vlgmr.msra.gmra.mrb[20].mxu0 %vm245_vm3, %v1902_v41 }
0x1897   :  { %2681 = vmatprep.mubr.msk.f32.mxu0 %vm245_vm3, %v1903_v12  ;;  %2889 = vmatpush3.bf16.msra.mxu0 %v2886_v17 }
0x1898   :  { %2891 = vmatprep.subr.bf16.mxu0 %v2890_v21 }
0x1899   :  { %v1904_v22 = vld [vmem:[#allocation2 + $0x18] sm:$0xff] }
0x189a   :  { %2682 = vmatmul.mubr.msk.f32.gmra.mrb[22].mxu0 %vm245_vm3, %v1904_v22 }
0x189b   :  { %2684 = vmatprep.mubr.msk.f32.mxu0 %vm245_vm3, %v1905_v25  ;;  %2893 = vmatpush3.bf16.msra.mxu0 %v2890_v21 }
0x189c   :  { %2895 = vmatprep.subr.bf16.mxu0 %v2894_v53 }
0x189d   :  { %v1906_v28 = vld [vmem:[#allocation2 + $0x28] sm:$0xff] }
0x189e   :  { %2685 = vmatmul.mubr.msk.f32.gmra.mrb[24].mxu0 %vm245_vm3, %v1906_v28 }
0x189f   :  { %2687 = vmatprep.mubr.msk.f32.mxu0 %vm245_vm3, %v1907_v33  ;;  %2897 = vmatpush3.bf16.msra.mxu0 %v2894_v53 }
0x18a0   :  { %2899 = vmatprep.subr.bf16.mxu0 %v2898_v26 }
0x18a3   :  { %2901 = vmatpush3.bf16.msra.mxu0 %v2898_v26 }
0x18a4   :  { %2903 = vmatprep.subr.bf16.mxu0 %v2902_v5 }
0x18a7   :  { %2905 = vmatpush3.bf16.msra.mxu0 %v2902_v5 }
0x18a8   :  { %2907 = vmatprep.subr.bf16.mxu0 %v2906_v37 }
0x18ab   :  { %2909 = vmatpush3.bf16.msra.mxu0 %v2906_v37 }
0x18ac   :  { %2911 = vmatprep.subr.bf16.mxu0 %v2910_v49 }
0x18af   :  { %2913 = vmatpush3.bf16.msra.mxu0 %v2910_v49 }
0x18b0   :  { %2915 = vmatprep.subr.bf16.mxu0 %v2914_v42 }
0x18b3   :  { %2917 = vmatpush3.bf16.msra.mxu0 %v2914_v42 }
0x18fe   :  { %v1898_v43 = vpop.permute.xlu0 %1897 }
0x18ff   :  { %1900 = vst.msk [vmem:[#allocation2 + $0x38] sm:$0xff] %vm245_vm3, %v1898_v43 }
0x1906   :  { %v1908_v54 = vld [vmem:[#allocation2 + $0x38] sm:$0xff] }
0x1907   :  { %2688 = vmatmul.mubr.msk.f32.gmra.mrb[26].mxu0 %vm245_vm3, %v1908_v54 }
0x1969   :  { %v2680_v47 = vpop.f32.mrb[20].mxu0 }
0x196a   :  { %v2016_v48 = vadd.f32 %v2680_v47, %v2249_v45  ;;  %v2010_v55 = vpop.f32.mrb[21].mxu0 }
0x196b   :  { %v2011_v50 = vadd.f32 %v2249_v45, %v2010_v55 }
0x196c   :  { %v2050_v59 = vmax.f32 %v2016_v48, 0.0 }
0x196d   :  { %v2049_v56 = vmax.f32 %v2011_v50, 0.0  ;;  %v2683_v57 = vpop.f32.mrb[22].mxu0 }
0x196e   :  { %v2026_v60 = vadd.f32 %v2683_v57, %v2249_v45  ;;  %v2020_v61 = vpop.f32.mrb[23].mxu0 }
0x196f   :  { %v2021_v63 = vadd.f32 %v2249_v45, %v2020_v61  ;;  %2722 = vmatprep.mubr.f32.mxu0 %v2049_v56 }
0x1970   :  { %2723 = vmatmul.mubr.f32.vlgmr.msra.gmra.mrb[28].mxu0 %v2050_v59  ;;  %v2052_v3 = vmax.f32 %v2026_v60, 0.0 }
0x1971   :  { %v2051_v2 = vmax.f32 %v2021_v63, 0.0  ;;  %v2686_v58 = vpop.f32.mrb[24].mxu0 }
0x1972   :  { %v2036_v4 = vadd.f32 %v2686_v58, %v2249_v45  ;;  %v2030_v51 = vpop.f32.mrb[25].mxu0 }
0x1973   :  { %v2031_v6 = vadd.f32 %v2249_v45, %v2030_v51  ;;  %2725 = vmatprep.mubr.f32.mxu0 %v2051_v2 }
0x1974   :  { %2726 = vmatmul.mubr.f32.gmra.mrb[30].mxu0 %v2052_v3  ;;  %v2054_v8 = vmax.f32 %v2036_v4, 0.0 }
0x1975   :  { %v2053_v7 = vmax.f32 %v2031_v6, 0.0 }
0x1977   :  { %2728 = vmatprep.mubr.f32.mxu0 %v2053_v7 }
0x1978   :  { %2729 = vmatmul.mubr.f32.gmra.mrb[32].mxu0 %v2054_v8 }
0x19da   :  { %v2689_v32 = vpop.f32.mrb[26].mxu0 }
0x19db   :  { %v2046_v9 = vadd.f32 %v2689_v32, %v2249_v45  ;;  %v2040_v62 = vpop.f32.mrb[27].mxu0 }
0x19dc   :  { %v2041_v11 = vadd.f32 %v2249_v45, %v2040_v62 }
0x19dd   :  { %v2056_v14 = vmax.f32 %v2046_v9, 0.0 }
0x19de   :  { %v2055_v29 = vmax.f32 %v2041_v11, 0.0 }
0x19e0   :  { %2731 = vmatprep.mubr.f32.mxu0 %v2055_v29 }
0x19e1   :  { %2732 = vmatmul.mubr.f32.gmra.mrb[34].mxu0 %v2056_v14 }
0x1a43   :  { %v2724_v16 = vpop.f32.mrb[28].mxu0 }
0x1a44   :  { %v2152_v1 = vadd.f32 %v2724_v16, %v2258_v15  ;;  %v2146_v31 = vpop.f32.mrb[29].mxu0 }
0x1a45   :  { %v2147_v17 = vadd.f32 %v2258_v15, %v2146_v31 }
0x1a46   :  { %v2186_v19 = vmax.f32 %v2152_v1, 0.0 }
0x1a47   :  { %v2185_v20 = vmax.f32 %v2147_v17, 0.0  ;;  %v2727_v18 = vpop.f32.mrb[30].mxu0 }
0x1a48   :  { %2194 = vst [vmem:[%s3724_s10 + $0x8] sm:$0xff] %v2186_v19  ;;  %v2162_v44 = vadd.f32 %v2727_v18, %v2258_v15  ;;  %v2156_v13 = vpop.f32.mrb[31].mxu0 }
0x1a49   :  { %2193 = vst [vmem:[%s3724_s10] sm:$0xff] %v2185_v20  ;;  %v2157_v52 = vadd.f32 %v2258_v15, %v2156_v13 }
0x1a4a   :  { %v2188_v21 = vmax.f32 %v2162_v44, 0.0 }
0x1a4b   :  { %v2187_v36 = vmax.f32 %v2157_v52, 0.0  ;;  %v2730_v41 = vpop.f32.mrb[32].mxu0 }
0x1a4c   :  { %2196 = vst [vmem:[%s3724_s10 + $0x18] sm:$0xff] %v2188_v21  ;;  %v2172_v0 = vadd.f32 %v2730_v41, %v2258_v15  ;;  %v2166_v46 = vpop.f32.mrb[33].mxu0 }
0x1a4d   :  { %2195 = vst [vmem:[%s3724_s10 + $0x10] sm:$0xff] %v2187_v36  ;;  %v2167_v12 = vadd.f32 %v2258_v15, %v2166_v46 }
0x1a4e   :  { %v2190_v53 = vmax.f32 %v2172_v0, 0.0 }
0x1a4f   :  { %v2189_v22 = vmax.f32 %v2167_v12, 0.0 }
0x1a50   :  { %2198 = vst [vmem:[%s3724_s10 + $0x28] sm:$0xff] %v2190_v53 }
0x1a51   :  { %2197 = vst [vmem:[%s3724_s10 + $0x20] sm:$0xff] %v2189_v22 }
0x1ab4   :  { %v2733_v23 = vpop.f32.mrb[34].mxu0 }
0x1ab5   :  { %v2182_v24 = vadd.f32 %v2733_v23, %v2258_v15  ;;  %v2176_v25 = vpop.f32.mrb[35].mxu0 }
0x1ab6   :  { %v2177_v26 = vadd.f32 %v2258_v15, %v2176_v25 }
0x1ab7   :  { %v2192_v28 = vmax.f32 %v2182_v24, 0.0 }
0x1ab8   :  { %v2191_v30 = vmax.f32 %v2177_v26, 0.0 }
0x1ab9   :  { %2200 = vst [vmem:[%s3724_s10 + $0x38] sm:$0xff] %v2192_v28 }
0x1aba   :  { %2199 = vst [vmem:[%s3724_s10 + $0x30] sm:$0xff] %v2191_v30 }
0x1abb   :  { %2205 = vsyncpa [#allocation4], 1 }
0x1abc   :  { %2206 = vsyncpa [#allocation6], 1 }

</bundles_post_ra>
